<compile_context>
chip_gen: v6e
topology: v6e:2x2x1
jax: 0.10.0
libtpu: 0.0.40
codegen_flags: <defaults>
</compile_context>

<pallas_src>
import jax
import jax.numpy as jnp
from jax.experimental import pallas as pl
from jax.experimental.pallas import tpu as pltpu

INPUT_SIZE = 2019
H1, H2, H3 = 256, 128, 64
H3_PAD = 128          # 64 -> 128: lane-dense layer-3 output / layer-4 K
OUT = 2
OUT_PAD = 128         # lane-dense output stores; wrapper slices [:, :OUT]
TM_MAX = 1024         # max batch-tile rows (~16 MiB double-buffered fp32 x tile)


def _cdiv(a, b):
    return -(-a // b)


def _round_up(a, m):
    return _cdiv(a, m) * m


def _mlp_kernel(x_ref,
                w1_ref, b1_ref,
                w2_ref, b2_ref,
                w3_ref, b3_ref,
                w4_ref, b4_ref,
                o_ref):
    """Fused 4-layer MLP: in-kernel fp32->bf16 cast, bf16 MXU matmuls, fp32 accumulate."""
    x = x_ref[...].astype(jnp.bfloat16)        # fp32 HBM read, VPU cast (free under DMA)

    h = jnp.dot(x, w1_ref[...], preferred_element_type=jnp.float32) + b1_ref[...]
    h = jnp.maximum(h, 0.0)
    # dropout1: identity (eval/inference mode)

    h = jnp.dot(h.astype(jnp.bfloat16), w2_ref[...],
                preferred_element_type=jnp.float32) + b2_ref[...]
    h = jnp.maximum(h, 0.0)
    # dropout2: identity (eval/inference mode)

    h = jnp.dot(h.astype(jnp.bfloat16), w3_ref[...],
                preferred_element_type=jnp.float32) + b3_ref[...]
    h = jnp.maximum(h, 0.0)

    h = jnp.dot(h.astype(jnp.bfloat16), w4_ref[...],
                preferred_element_type=jnp.float32) + b4_ref[...]
    o_ref[...] = h.astype(o_ref.dtype)         # bf16 lane-dense store


def prepare_params(params):
    """One-time (offline) weight prep: pad H3/OUT dims, cast weights to bf16.

    params: dict of (w, b) with w stored as [in, out] (PyTorch weight transposed).
    Zero padding is inert: padded w3 cols + zero b3 give ReLU(0)=0 activations, which
    hit zero-padded w4 rows; padded w4 cols only feed output lanes that get sliced off.
    """
    (w1, b1), (w2, b2), (w3, b3), (w4, b4) = (
        params["fc1"], params["fc2"], params["fc3"], params["fc4"])

    w3p = jnp.zeros((H2, H3_PAD), jnp.float32).at[:, :H3].set(w3)
    b3p = jnp.zeros((H3_PAD,), jnp.float32).at[:H3].set(b3)
    w4p = jnp.zeros((H3_PAD, OUT_PAD), jnp.float32).at[:H3, :OUT].set(w4)
    b4p = jnp.zeros((OUT_PAD,), jnp.float32).at[:OUT].set(b4)

    bf = lambda w: w.astype(jnp.bfloat16)
    row = lambda b: b.reshape(1, -1).astype(jnp.float32)
    return {
        "w1": bf(w1),  "b1": row(b1),
        "w2": bf(w2),  "b2": row(b2),
        "w3": bf(w3p), "b3": row(b3p),
        "w4": bf(w4p), "b4": row(b4p),
    }


@jax.jit
def ann_forward(x, p):
    """x: [B, INPUT_SIZE] float32. p: prepare_params() output. Returns [B, 2] float32."""
    B = x.shape[0]

    # Grid/tile selection: bounded padding (<8 rows/block) and >=2 blocks once the
    # batch is large enough to feed both v7x TensorCores.
    n_blocks = max(_cdiv(B, TM_MAX), 2 if B >= 64 else 1)
    TM = _round_up(_cdiv(B, n_blocks), 8)

    w1, b1, w2, b2 = p["w1"], p["b1"], p["w2"], p["b2"]
    w3, b3, w4, b4 = p["w3"], p["b3"], p["w4"], p["b4"]

    const = lambda arr: pl.BlockSpec(arr.shape, lambda i: (0, 0))  # VMEM-resident

    flops = 2 * n_blocks * TM * (INPUT_SIZE * H1 + H1 * H2 + H2 * H3_PAD
                                 + H3_PAD * OUT_PAD)
    bytes_accessed = (x.size * x.dtype.itemsize
                      + sum(w.size * 2 for w in (w1, w2, w3, w4))
                      + sum(b.size * 4 for b in (b1, b2, b3, b4))
                      + B * OUT_PAD * 2)

    out = pl.pallas_call(
        _mlp_kernel,
        out_shape=jax.ShapeDtypeStruct((B, OUT_PAD), jnp.bfloat16),
        grid=(n_blocks,),
        in_specs=[
            pl.BlockSpec((TM, INPUT_SIZE), lambda i: (i, 0)),   # full-extent K (2019)
            const(w1), const(b1),
            const(w2), const(b2),
            const(w3), const(b3),
            const(w4), const(b4),
        ],
        out_specs=pl.BlockSpec((TM, OUT_PAD), lambda i: (i, 0)),
        compiler_params=pltpu.CompilerParams(
            dimension_semantics=("parallel",),
            vmem_limit_bytes=48 * 1024 * 1024),
        cost_estimate=pl.CostEstimate(
            flops=flops, transcendentals=0, bytes_accessed=bytes_accessed),
    )(x, w1, b1, w2, b2, w3, b3, w4, b4)

    return out[:, :OUT].astype(jnp.float32)


def init_params(key):
    """Deterministic parameter init (uniform, PyTorch-Linear-style bounds), fp32."""
    def linear(key, fan_in, fan_out):
        kw, kb = jax.random.split(key)
        bound = 1.0 / jnp.sqrt(fan_in)
        w = jax.random.uniform(kw, (fan_in, fan_out), jnp.float32, -bound, bound)
        b = jax.random.uniform(kb, (fan_out,), jnp.float32, -bound, bound)
        return w, b

    k1, k2, k3, k4 = jax.random.split(key, 4)
    return {
        "fc1": linear(k1, INPUT_SIZE, H1),
        "fc2": linear(k2, H1, H2),
        "fc3": linear(k3, H2, H3),
        "fc4": linear(k4, H3, OUT),
    }


def _reference(x, p):
    """Pure-JAX mirror of the kernel's numerics (bf16 matmul inputs, fp32 accumulate).

    Note: numerics intentionally differ from the fp32 PyTorch model (bf16 matmul
    inputs); this only validates the bf16 pipeline, not fp32 parity.
    """
    f32 = lambda a: a.astype(jnp.float32)
    bf = lambda a: a.astype(jnp.bfloat16)
    h = f32(bf(x)) @ f32(p["w1"]) + p["b1"]
    h = jnp.maximum(h, 0.0)
    h = f32(bf(h)) @ f32(p["w2"]) + p["b2"]
    h = jnp.maximum(h, 0.0)
    h = f32(bf(h)) @ f32(p["w3"]) + p["b3"]
    h = jnp.maximum(h, 0.0)
    h = f32(bf(h)) @ f32(p["w4"]) + p["b4"]
    return h[:, :OUT]


if __name__ == "__main__":
    key = jax.random.PRNGKey(0)
    kx, kp = jax.random.split(key)

    B = 8  # small batch demo
    x = jax.random.normal(kx, (B, INPUT_SIZE), jnp.float32)
    params = init_params(kp)
    prepped = prepare_params(params)

    out = jax.block_until_ready(ann_forward(x, prepped))
    assert out.shape == (B, OUT), out.shape

    ref = _reference(x, prepped)
    max_err = float(jnp.max(jnp.abs(out - ref)))
    assert jnp.allclose(out, ref, atol=2e-2, rtol=2e-2), max_err

    print("KERNEL_OK")
</pallas_src>

<mosaic_0001>
module attributes {stable_mosaic.version = 11 : i64} {
  func.func @_mlp_kernel(%arg0: i32, %arg1: memref<8x2019xf32, #tpu.memory_space<vmem>>, %arg2: memref<2019x256xbf16, #tpu.memory_space<vmem>>, %arg3: memref<1x256xf32, #tpu.memory_space<vmem>>, %arg4: memref<256x128xbf16, #tpu.memory_space<vmem>>, %arg5: memref<1x128xf32, #tpu.memory_space<vmem>>, %arg6: memref<128x128xbf16, #tpu.memory_space<vmem>>, %arg7: memref<1x128xf32, #tpu.memory_space<vmem>>, %arg8: memref<128x128xbf16, #tpu.memory_space<vmem>>, %arg9: memref<1x128xf32, #tpu.memory_space<vmem>>, %arg10: memref<8x128xbf16, #tpu.memory_space<vmem>>) attributes {dimension_semantics = [#tpu.dimension_semantics<parallel>], iteration_bounds = array<i64: 1>, scalar_prefetch = 0 : i64, scratch_operands = 0 : i64, tpu.core_type = #tpu.core_type<tc>, window_params = [{transform_indices = @transform_0, window_bounds = array<i64: 8, 2019>}, {pipeline_mode = #tpu.pipeline_mode<synchronous>, transform_indices = @transform_1, window_bounds = array<i64: 2019, 256>}, {pipeline_mode = #tpu.pipeline_mode<synchronous>, transform_indices = @transform_2, window_bounds = array<i64: 1, 256>}, {pipeline_mode = #tpu.pipeline_mode<synchronous>, transform_indices = @transform_3, window_bounds = array<i64: 256, 128>}, {pipeline_mode = #tpu.pipeline_mode<synchronous>, transform_indices = @transform_4, window_bounds = array<i64: 1, 128>}, {pipeline_mode = #tpu.pipeline_mode<synchronous>, transform_indices = @transform_5, window_bounds = array<i64: 128, 128>}, {pipeline_mode = #tpu.pipeline_mode<synchronous>, transform_indices = @transform_6, window_bounds = array<i64: 1, 128>}, {pipeline_mode = #tpu.pipeline_mode<synchronous>, transform_indices = @transform_7, window_bounds = array<i64: 128, 128>}, {pipeline_mode = #tpu.pipeline_mode<synchronous>, transform_indices = @transform_8, window_bounds = array<i64: 1, 128>}, {transform_indices = @transform_9, window_bounds = array<i64: 8, 128>}]} {
    %c0 = arith.constant 0 : index
    %c0_0 = arith.constant 0 : index
    %0 = vector.load %arg1[%c0, %c0_0] : memref<8x2019xf32, #tpu.memory_space<vmem>>, vector<8x2019xf32>
    %1 = arith.truncf %0 : vector<8x2019xf32> to vector<8x2019xbf16>
    %c0_1 = arith.constant 0 : index
    %c0_2 = arith.constant 0 : index
    %2 = vector.load %arg2[%c0_1, %c0_2] : memref<2019x256xbf16, #tpu.memory_space<vmem>>, vector<2019x256xbf16>
    %cst = arith.constant dense<0.000000e+00> : vector<8x256xf32>
    %3 = tpu.matmul %1, %2, %cst {dimension_numbers = #tpu.dot_dimension_numbers<[1], [0], [0], [1], [0, 0, 1, 1], [], []>} : vector<8x2019xbf16>, vector<2019x256xbf16>, vector<8x256xf32> -> vector<8x256xf32>
    %c0_3 = arith.constant 0 : index
    %c0_4 = arith.constant 0 : index
    %4 = vector.load %arg3[%c0_3, %c0_4] : memref<1x256xf32, #tpu.memory_space<vmem>>, vector<1x256xf32>
    %5 = vector.broadcast %4 : vector<1x256xf32> to vector<8x256xf32>
    %6 = arith.addf %3, %5 : vector<8x256xf32>
    %cst_5 = arith.constant 0.000000e+00 : f32
    %7 = vector.broadcast %cst_5 : f32 to vector<8x256xf32>
    %8 = arith.maximumf %6, %7 : vector<8x256xf32>
    %9 = arith.truncf %8 : vector<8x256xf32> to vector<8x256xbf16>
    %c0_6 = arith.constant 0 : index
    %c0_7 = arith.constant 0 : index
    %10 = vector.load %arg4[%c0_6, %c0_7] : memref<256x128xbf16, #tpu.memory_space<vmem>>, vector<256x128xbf16>
    %cst_8 = arith.constant dense<0.000000e+00> : vector<8x128xf32>
    %11 = tpu.matmul %9, %10, %cst_8 {dimension_numbers = #tpu.dot_dimension_numbers<[1], [0], [0], [1], [0, 0, 1, 1], [], []>} : vector<8x256xbf16>, vector<256x128xbf16>, vector<8x128xf32> -> vector<8x128xf32>
    %c0_9 = arith.constant 0 : index
    %c0_10 = arith.constant 0 : index
    %12 = vector.load %arg5[%c0_9, %c0_10] : memref<1x128xf32, #tpu.memory_space<vmem>>, vector<1x128xf32>
    %13 = vector.broadcast %12 : vector<1x128xf32> to vector<8x128xf32>
    %14 = arith.addf %11, %13 : vector<8x128xf32>
    %cst_11 = arith.constant 0.000000e+00 : f32
    %15 = vector.broadcast %cst_11 : f32 to vector<8x128xf32>
    %16 = arith.maximumf %14, %15 : vector<8x128xf32>
    %17 = arith.truncf %16 : vector<8x128xf32> to vector<8x128xbf16>
    %c0_12 = arith.constant 0 : index
    %c0_13 = arith.constant 0 : index
    %18 = vector.load %arg6[%c0_12, %c0_13] : memref<128x128xbf16, #tpu.memory_space<vmem>>, vector<128x128xbf16>
    %cst_14 = arith.constant dense<0.000000e+00> : vector<8x128xf32>
    %19 = tpu.matmul %17, %18, %cst_14 {dimension_numbers = #tpu.dot_dimension_numbers<[1], [0], [0], [1], [0, 0, 1, 1], [], []>} : vector<8x128xbf16>, vector<128x128xbf16>, vector<8x128xf32> -> vector<8x128xf32>
    %c0_15 = arith.constant 0 : index
    %c0_16 = arith.constant 0 : index
    %20 = vector.load %arg7[%c0_15, %c0_16] : memref<1x128xf32, #tpu.memory_space<vmem>>, vector<1x128xf32>
    %21 = vector.broadcast %20 : vector<1x128xf32> to vector<8x128xf32>
    %22 = arith.addf %19, %21 : vector<8x128xf32>
    %cst_17 = arith.constant 0.000000e+00 : f32
    %23 = vector.broadcast %cst_17 : f32 to vector<8x128xf32>
    %24 = arith.maximumf %22, %23 : vector<8x128xf32>
    %25 = arith.truncf %24 : vector<8x128xf32> to vector<8x128xbf16>
    %c0_18 = arith.constant 0 : index
    %c0_19 = arith.constant 0 : index
    %26 = vector.load %arg8[%c0_18, %c0_19] : memref<128x128xbf16, #tpu.memory_space<vmem>>, vector<128x128xbf16>
    %cst_20 = arith.constant dense<0.000000e+00> : vector<8x128xf32>
    %27 = tpu.matmul %25, %26, %cst_20 {dimension_numbers = #tpu.dot_dimension_numbers<[1], [0], [0], [1], [0, 0, 1, 1], [], []>} : vector<8x128xbf16>, vector<128x128xbf16>, vector<8x128xf32> -> vector<8x128xf32>
    %c0_21 = arith.constant 0 : index
    %c0_22 = arith.constant 0 : index
    %28 = vector.load %arg9[%c0_21, %c0_22] : memref<1x128xf32, #tpu.memory_space<vmem>>, vector<1x128xf32>
    %29 = vector.broadcast %28 : vector<1x128xf32> to vector<8x128xf32>
    %30 = arith.addf %27, %29 : vector<8x128xf32>
    %31 = arith.truncf %30 : vector<8x128xf32> to vector<8x128xbf16>
    %c0_23 = arith.constant 0 : index
    %c0_24 = arith.constant 0 : index
    %32 = vector.load %arg10[%c0_23, %c0_24] : memref<8x128xbf16, #tpu.memory_space<vmem>>, vector<8x128xbf16>
    tpu.vector_store %arg10[%c0_23, %c0_24], %31 {strides = array<i32>} : memref<8x128xbf16, #tpu.memory_space<vmem>>, vector<8x128xbf16>,
    return
  }
  func.func @transform_0(%arg0: i32) -> (i32, i32) {
    %c0_i32 = arith.constant 0 : i32
    %c0_i32_0 = arith.constant 0 : i32
    return %arg0, %c0_i32 : i32, i32
  }
  func.func @transform_1(%arg0: i32) -> (i32, i32) {
    %c0_i32 = arith.constant 0 : i32
    %c0_i32_0 = arith.constant 0 : i32
    %c0_i32_1 = arith.constant 0 : i32
    return %c0_i32, %c0_i32_0 : i32, i32
  }
  func.func @transform_2(%arg0: i32) -> (i32, i32) {
    %c0_i32 = arith.constant 0 : i32
    %c0_i32_0 = arith.constant 0 : i32
    %c0_i32_1 = arith.constant 0 : i32
    return %c0_i32, %c0_i32_0 : i32, i32
  }
  func.func @transform_3(%arg0: i32) -> (i32, i32) {
    %c0_i32 = arith.constant 0 : i32
    %c0_i32_0 = arith.constant 0 : i32
    %c0_i32_1 = arith.constant 0 : i32
    return %c0_i32, %c0_i32_0 : i32, i32
  }
  func.func @transform_4(%arg0: i32) -> (i32, i32) {
    %c0_i32 = arith.constant 0 : i32
    %c0_i32_0 = arith.constant 0 : i32
    %c0_i32_1 = arith.constant 0 : i32
    return %c0_i32, %c0_i32_0 : i32, i32
  }
  func.func @transform_5(%arg0: i32) -> (i32, i32) {
    %c0_i32 = arith.constant 0 : i32
    %c0_i32_0 = arith.constant 0 : i32
    %c0_i32_1 = arith.constant 0 : i32
    return %c0_i32, %c0_i32_0 : i32, i32
  }
  func.func @transform_6(%arg0: i32) -> (i32, i32) {
    %c0_i32 = arith.constant 0 : i32
    %c0_i32_0 = arith.constant 0 : i32
    %c0_i32_1 = arith.constant 0 : i32
    return %c0_i32, %c0_i32_0 : i32, i32
  }
  func.func @transform_7(%arg0: i32) -> (i32, i32) {
    %c0_i32 = arith.constant 0 : i32
    %c0_i32_0 = arith.constant 0 : i32
    %c0_i32_1 = arith.constant 0 : i32
    return %c0_i32, %c0_i32_0 : i32, i32
  }
  func.func @transform_8(%arg0: i32) -> (i32, i32) {
    %c0_i32 = arith.constant 0 : i32
    %c0_i32_0 = arith.constant 0 : i32
    %c0_i32_1 = arith.constant 0 : i32
    return %c0_i32, %c0_i32_0 : i32, i32
  }
  func.func @transform_9(%arg0: i32) -> (i32, i32) {
    %c0_i32 = arith.constant 0 : i32
    %c0_i32_0 = arith.constant 0 : i32
    return %arg0, %c0_i32 : i32, i32
  }
}

</mosaic_0001>

<bundles_post_ra>
// kernel: ann_forward.1
= control target key start
LH: loop header
LB: loop body
LE: loop exit
PB: predicated region body
PF: predicated region fallthrough
CT: control target
= control target key end

     0   :  { %14 = vsyncpa [#allocation3], 0  ;;  %s3473_s0 = inlined_call_operand.hbm [shape: f32[8,2019], index: 0, kind: input, shape index: {}]   ;;  %s3474_s1 = inlined_call_operand.hbm [shape: bf16[2019,256], index: 1, kind: input, shape index: {}]   ;;  %s3475_s2 = inlined_call_operand.hbm [shape: f32[1,256], index: 2, kind: input, shape index: {}]   ;;  %s3476_s3 = inlined_call_operand.hbm [shape: bf16[256,128], index: 3, kind: input, shape index: {}]   ;;  %s3477_s4 = inlined_call_operand.vmem [shape: f32[1,128], index: 4, kind: input, shape index: {}]   ;;  %s3478_s5 = inlined_call_operand.hbm [shape: bf16[128,128], index: 5, kind: input, shape index: {}]   ;;  %s3479_s6 = inlined_call_operand.vmem [shape: f32[1,128], index: 6, kind: input, shape index: {}]   ;;  %s3480_s7 = inlined_call_operand.hbm [shape: bf16[128,128], index: 7, kind: input, shape index: {}]   ;;  %s3481_s8 = inlined_call_operand.vmem [shape: f32[1,128], index: 8, kind: input, shape index: {}]   ;;  %s3482_s9 = inlined_call_operand.vmem [shape: bf16[8,128], index: 9, kind: output, shape index: {}]  }
   0x1   :  { %15 = vsyncpa [#allocation5], 0 }
   0x2   :  { %16 = vsyncpa [#allocation8], 0 }
   0x3   :  { %17 = vsyncpa [#allocation11], 0  ;;  %s3353_s30 = smov [#allocation4]  }
   0x4   :  { %s33_s10 = sshll.u32 %s3353_s30, 4  ;;  %s34_s10 = int_to_ptr.vmem [resolvable:$true] %s33_s10 }
   0x5   :  { %s3233_s11 = scalar_lea.vmem %s34_s10, 32384  ;;  %p3238_p1 = scmp.lt.s32.totalorder %s34_s10, %s34_s10 }
   0x6   :  { %p3234_p0 = scmp.ne.s32.totalorder %s34_s10, %s3233_s11  ;;  %p3239_p2 = scmp.lt.s32.totalorder %s3233_s11, %s3233_s11 }
   0x8   :  { %p3240_p3 = por %p3239_p2, %p3238_p1 }
   0xa   :  { %p3241_p4 = pnand %p3240_p3, %p3234_p0 }
   0xc   :  { %3244 = shalt.err (!%p3241_p4)
}
   0xd   :  { %s3354_s12 = smov 128   ;;  %s3355_s13 = smov 8  }
   0xe   :  { %39 = dma.hbm_to_vmem [thread:$0]  %s3474_s1, 32384, %s34_s10, [#allocation5], %s3354_s12, %s3354_s12, %s3355_s13  }
   0xf   :  { %s3356_s16 = smov [#allocation7]  }
  0x10   :  { %s55_s17 = sshll.u32 %s3356_s16, 4  ;;  %s56_s17 = int_to_ptr.vmem [resolvable:$true] %s55_s17 }
  0x11   :  { %s3253_s18 = scalar_lea.vmem %s56_s17, 2048  ;;  %p3258_p6 = scmp.lt.s32.totalorder %s56_s17, %s56_s17 }
  0x12   :  { %p3254_p5 = scmp.ne.s32.totalorder %s56_s17, %s3253_s18  ;;  %p3259_p7 = scmp.lt.s32.totalorder %s3253_s18, %s3253_s18 }
  0x14   :  { %p3260_p8 = por %p3259_p7, %p3258_p6 }
  0x16   :  { %p3261_p9 = pnand %p3260_p8, %p3254_p5 }
  0x18   :  { %3264 = shalt.err (!%p3261_p9)
}
  0x19   :  { %s3357_s19 = smov 64   ;;  %s3358_s20 = smov 4  }
  0x1a   :  { %61 = dma.hbm_to_vmem [thread:$0]  %s3476_s3, 2048, %s56_s17, [#allocation8], %s3357_s19, %s3357_s19, %s3358_s20  }
  0x1b   :  { %s3359_s1 = smov [#allocation2]   ;;  %s3360_s24 = smov [#allocation6]  }
  0x1c   :  { %s24_s23 = sshll.u32 %s3359_s1, 4  ;;  %s46_s25 = sshll.u32 %s3360_s24, 4  ;;  %s25_s23 = int_to_ptr.vmem [resolvable:$true] %s24_s23  ;;  %s47_s25 = int_to_ptr.vmem [resolvable:$true] %s46_s25 }
  0x1d   :  { %s3273_s26 = scalar_lea.vmem %s25_s23, 2048  ;;  %p3278_p11 = scmp.lt.s32.totalorder %s25_s23, %s25_s23 }
  0x1e   :  { %p3274_p10 = scmp.ne.s32.totalorder %s25_s23, %s3273_s26  ;;  %p3279_p12 = scmp.lt.s32.totalorder %s3273_s26, %s3273_s26 }
  0x20   :  { %p3280_p13 = por %p3279_p12, %p3278_p11 }
  0x22   :  { %p3281_p0 = pnand %p3280_p13, %p3274_p10 }
  0x24   :  { %3284 = shalt.err (!%p3281_p0)
}
  0x25   :  { %27 = dma.hbm_to_vmem [thread:$0]  %s3473_s0, 2048, %s25_s23, [#allocation3]  }
  0x26   :  { %s3293_s29 = scalar_lea.vmem %s47_s25, 32  ;;  %p3298_p2 = scmp.lt.s32.totalorder %s47_s25, %s47_s25 }
  0x27   :  { %p3294_p1 = scmp.ne.s32.totalorder %s47_s25, %s3293_s29  ;;  %p3299_p3 = scmp.lt.s32.totalorder %s3293_s29, %s3293_s29 }
  0x29   :  { %p3300_p4 = por %p3299_p3, %p3298_p2 }
  0x2b   :  { %p3301_p5 = pnand %p3300_p4, %p3294_p1 }
  0x2d   :  { %3304 = shalt.err (!%p3301_p5)
}
  0x2e   :  { %49 = dma.hbm_to_vmem [thread:$0]  %s3475_s2, 32, %s47_s25, [#allocation5]  }
  0x2f   :  { %s3361_s10 = smov [#allocation9]   ;;  %s3362_s12 = smov [#allocation10]  }
  0x30   :  { %s69_s11 = sshll.u32 %s3361_s10, 4  ;;  %s83_s13 = sshll.u32 %s3362_s12, 4  ;;  %s70_s11 = int_to_ptr.vmem [resolvable:$true] %s69_s11  ;;  %s84_s13 = int_to_ptr.vmem [resolvable:$true] %s83_s13 }
  0x31   :  { %s3313_s14 = scalar_lea.vmem %s70_s11, 1024  ;;  %p3318_p7 = scmp.lt.s32.totalorder %s70_s11, %s70_s11 }
  0x32   :  { %p3314_p6 = scmp.ne.s32.totalorder %s70_s11, %s3313_s14  ;;  %p3319_p8 = scmp.lt.s32.totalorder %s3313_s14, %s3313_s14 }
  0x34   :  { %p3320_p9 = por %p3319_p8, %p3318_p7 }
  0x36   :  { %p3321_p10 = pnand %p3320_p9, %p3314_p6 }
  0x38   :  { %3324 = shalt.err (!%p3321_p10)
}
  0x39   :  { %75 = dma.hbm_to_vmem [thread:$0]  %s3478_s5, 1024, %s70_s11, [#allocation8], %s3357_s19, %s3357_s19, %s3358_s20  }
  0x3a   :  { %s3333_s2 = scalar_lea.vmem %s84_s13, 1024  ;;  %p3338_p12 = scmp.lt.s32.totalorder %s84_s13, %s84_s13 }
  0x3b   :  { %p3334_p11 = scmp.ne.s32.totalorder %s84_s13, %s3333_s2  ;;  %p3339_p13 = scmp.lt.s32.totalorder %s3333_s2, %s3333_s2 }
  0x3d   :  { %p3340_p0 = por %p3339_p13, %p3338_p12 }
  0x3f   :  { %p3341_p1 = pnand %p3340_p0, %p3334_p11 }
  0x41   :  { %3344 = shalt.err (!%p3341_p1)
}
  0x42   :  { %89 = dma.hbm_to_vmem [thread:$0]  %s3480_s7, 1024, %s84_s13, [#allocation11], %s3357_s19, %s3357_s19, %s3358_s20  }
  0x43   :  { %3345 = dma.done.wait [#allocation3], 2048  }
  0x44   :  { %3346 = vsyncadd [#allocation3], 4294965248 }
  0x45   :  { %3347 = dma.done.wait [#allocation5], 32416  }
  0x46   :  { %3348 = vsyncadd [#allocation5], 4294934880 }
  0x47   :  { %3349 = dma.done.wait [#allocation8], 3072  }
  0x48   :  { %3350 = vsyncadd [#allocation8], 4294964224 }
  0x49   :  { %3351 = dma.done.wait [#allocation11], 1024  }
  0x4a   :  { %3352 = vsyncadd [#allocation11], 4294966272  ;;  %v2813_v0 = vld [vmem:[#allocation4 + $0x74] ss:$8 sps:$4 sm:$0xff]   ;;  %v2817_v2 = vld [vmem:[#allocation4 + $0x70] ss:$8 sps:$4 sm:$0xff]  }
  0x4b   :  { %v2815_v1 = vld [vmem:[#allocation4 + $0x174] ss:$8 sps:$4 sm:$0xff]   ;;  %1687 = vmatprep.subr.bf16.mxu0 %v2813_v0  ;;  %v2818_v3 = vld [vmem:[#allocation4 + $0x170] ss:$8 sps:$4 sm:$0xff]   ;;  %v2819_v4 = vld [vmem:[#allocation4 + $0x64] ss:$8 sps:$4 sm:$0xff]  }
  0x4c   :  { %1728 = vmatprep.subr.bf16.mxu1 %v2815_v1  ;;  %1688 = vmatpush1.bf16.msra.mxu0 %v2817_v2  ;;  %v2821_v5 = vld [vmem:[#allocation4 + $0x164] ss:$8 sps:$4 sm:$0xff]   ;;  %v2823_v6 = vld [vmem:[#allocation4 + $0x60] ss:$8 sps:$4 sm:$0xff]   ;;  %v2825_v8 = vld [vmem:[#allocation4 + $0x54] ss:$8 sps:$4 sm:$0xff]  }
  0x4d   :  { %1729 = vmatpush1.bf16.msra.mxu1 %v2818_v3  ;;  %1689 = vmatprep.subr.bf16.mxu0 %v2819_v4  ;;  %v2824_v7 = vld [vmem:[#allocation4 + $0x160] ss:$8 sps:$4 sm:$0xff]   ;;  %v2827_v9 = vld [vmem:[#allocation4 + $0x154] ss:$8 sps:$4 sm:$0xff]   ;;  %v2829_v10 = vld [vmem:[#allocation4 + $0x50] ss:$8 sps:$4 sm:$0xff]  }
  0x4e   :  { %1730 = vmatprep.subr.bf16.mxu1 %v2821_v5  ;;  %v2830_v11 = vld [vmem:[#allocation4 + $0x150] ss:$8 sps:$4 sm:$0xff]   ;;  %v2831_v12 = vld [vmem:[#allocation4 + $0x44] ss:$8 sps:$4 sm:$0xff]   ;;  %v2835_v14 = vld [vmem:[#allocation4 + $0x40] ss:$8 sps:$4 sm:$0xff]  }
  0x4f   :  { %v2833_v13 = vld [vmem:[#allocation4 + $0x144] ss:$8 sps:$4 sm:$0xff]   ;;  %v2836_v15 = vld [vmem:[#allocation4 + $0x140] ss:$8 sps:$4 sm:$0xff]   ;;  %v2837_v16 = vld [vmem:[#allocation4 + $0x34] ss:$8 sps:$4 sm:$0xff]  }
  0x50   :  { %1690 = vmatpush1.bf16.msra.mxu0 %v2823_v6  ;;  %v2839_v17 = vld [vmem:[#allocation4 + $0x134] ss:$8 sps:$4 sm:$0xff]   ;;  %v2841_v18 = vld [vmem:[#allocation4 + $0x30] ss:$8 sps:$4 sm:$0xff]   ;;  %v2843_v20 = vld [vmem:[#allocation4 + $0x24] ss:$8 sps:$4 sm:$0xff]  }
  0x51   :  { %1731 = vmatpush1.bf16.msra.mxu1 %v2824_v7  ;;  %1691 = vmatprep.subr.bf16.mxu0 %v2825_v8  ;;  %v2842_v19 = vld [vmem:[#allocation4 + $0x130] ss:$8 sps:$4 sm:$0xff]   ;;  %v2845_v21 = vld [vmem:[#allocation4 + $0x124] ss:$8 sps:$4 sm:$0xff]   ;;  %v2847_v22 = vld [vmem:[#allocation4 + $0x20] ss:$8 sps:$4 sm:$0xff]  }
  0x52   :  { %1732 = vmatprep.subr.bf16.mxu1 %v2827_v9  ;;  %v2848_v23 = vld [vmem:[#allocation4 + $0x120] ss:$8 sps:$4 sm:$0xff]   ;;  %v2849_v24 = vld [vmem:[#allocation4 + $0x14] ss:$8 sps:$4 sm:$0xff]   ;;  %v2853_v26 = vld [vmem:[#allocation4 + $0x10] ss:$8 sps:$4 sm:$0xff]  }
  0x53   :  { %v2851_v25 = vld [vmem:[#allocation4 + $0x114] ss:$8 sps:$4 sm:$0xff]   ;;  %v2854_v27 = vld [vmem:[#allocation4 + $0x110] ss:$8 sps:$4 sm:$0xff]   ;;  %v2855_v28 = vld [vmem:[#allocation4 + $0x4] ss:$8 sps:$4 sm:$0xff]  }
  0x54   :  { %1692 = vmatpush1.bf16.msra.mxu0 %v2829_v10  ;;  %v2857_v29 = vld [vmem:[#allocation4 + $0x104] ss:$8 sps:$4 sm:$0xff]   ;;  %v2859_v30 = vld [vmem:[#allocation4] ss:$8 sps:$4 sm:$0xff]   ;;  %v2861_v32 = vld [vmem:[#allocation4 + $0xf4] ss:$8 sps:$4 sm:$0xff]  }
  0x55   :  { %1733 = vmatpush1.bf16.msra.mxu1 %v2830_v11  ;;  %1693 = vmatprep.subr.bf16.mxu0 %v2831_v12  ;;  %v2860_v31 = vld [vmem:[#allocation4 + $0x100] ss:$8 sps:$4 sm:$0xff]   ;;  %v2863_v33 = vld [vmem:[#allocation4 + $0x1f4] ss:$8 sps:$4 sm:$0xff]   ;;  %v2865_v34 = vld [vmem:[#allocation4 + $0xf0] ss:$8 sps:$4 sm:$0xff]  }
  0x56   :  { %1734 = vmatprep.subr.bf16.mxu1 %v2833_v13  ;;  %v2866_v35 = vld [vmem:[#allocation4 + $0x1f0] ss:$8 sps:$4 sm:$0xff]   ;;  %v2867_v36 = vld [vmem:[#allocation4 + $0xe4] ss:$8 sps:$4 sm:$0xff]   ;;  %v2871_v38 = vld [vmem:[#allocation4 + $0xe0] ss:$8 sps:$4 sm:$0xff]  }
  0x57   :  { %v2869_v37 = vld [vmem:[#allocation4 + $0x1e4] ss:$8 sps:$4 sm:$0xff]   ;;  %v2872_v39 = vld [vmem:[#allocation4 + $0x1e0] ss:$8 sps:$4 sm:$0xff]   ;;  %v2873_v40 = vld [vmem:[#allocation4 + $0xd4] ss:$8 sps:$4 sm:$0xff]  }
  0x58   :  { %1694 = vmatpush1.bf16.msra.mxu0 %v2835_v14  ;;  %v2875_v41 = vld [vmem:[#allocation4 + $0x1d4] ss:$8 sps:$4 sm:$0xff]   ;;  %v2877_v42 = vld [vmem:[#allocation4 + $0xd0] ss:$8 sps:$4 sm:$0xff]   ;;  %v2879_v44 = vld [vmem:[#allocation4 + $0xc4] ss:$8 sps:$4 sm:$0xff]  }
  0x59   :  { %1735 = vmatpush1.bf16.msra.mxu1 %v2836_v15  ;;  %1695 = vmatprep.subr.bf16.mxu0 %v2837_v16  ;;  %v2878_v43 = vld [vmem:[#allocation4 + $0x1d0] ss:$8 sps:$4 sm:$0xff]   ;;  %v2881_v45 = vld [vmem:[#allocation4 + $0x1c4] ss:$8 sps:$4 sm:$0xff]   ;;  %v2883_v47 = vld [vmem:[#allocation4 + $0xc0] ss:$8 sps:$4 sm:$0xff]  }
  0x5a   :  { %1736 = vmatprep.subr.bf16.mxu1 %v2839_v17  ;;  %v112_v46 = vld [vmem:[#allocation2 + $0x8] sm:$0xff]  ;;  %v114_v49 = vld [vmem:[#allocation2 + $0x18] sm:$0xff]  ;;  %v111_v4 = vld [vmem:[#allocation2] sm:$0xff]  ;;  %vm1673_vm0 = vcmask 809984   ;;  %vm1677_vm1 = vcmask 1040384   ;;  %vm1678_vm2 = vcmask 1041408  }
  0x5b   :  { %v128_v48 = vpack.c.bf16 %v112_v46, %v112_v46  ;;  %v2884_v50 = vld [vmem:[#allocation4 + $0x1c0] ss:$8 sps:$4 sm:$0xff]   ;;  %v2885_v51 = vld [vmem:[#allocation4 + $0xb4] ss:$8 sps:$4 sm:$0xff]   ;;  %v130_v52 = vpack.c.bf16 %v114_v49, %v114_v49  ;;  %v2889_v54 = vld [vmem:[#allocation4 + $0xb0] ss:$8 sps:$4 sm:$0xff]   ;;  %v127_v8 = vpack.c.bf16 %v111_v4, %v111_v4 }
  0x5c   :  { %1696 = vmatpush1.bf16.msra.mxu0 %v2841_v18  ;;  %v2887_v53 = vld [vmem:[#allocation4 + $0x1b4] ss:$8 sps:$4 sm:$0xff]   ;;  %v2890_v55 = vld [vmem:[#allocation4 + $0x1b0] ss:$8 sps:$4 sm:$0xff]   ;;  %v2891_v56 = vld [vmem:[#allocation4 + $0xa4] ss:$8 sps:$4 sm:$0xff]  }
  0x5d   :  { %1737 = vmatpush1.bf16.msra.mxu1 %v2842_v19  ;;  %1697 = vmatprep.subr.bf16.mxu0 %v2843_v20  ;;  %v2893_v57 = vld [vmem:[#allocation4 + $0x1a4] ss:$8 sps:$4 sm:$0xff]   ;;  %v2895_v58 = vld [vmem:[#allocation4 + $0xa0] ss:$8 sps:$4 sm:$0xff]   ;;  %v2897_v60 = vld [vmem:[#allocation4 + $0x94] ss:$8 sps:$4 sm:$0xff]  }
  0x5e   :  { %1738 = vmatprep.subr.bf16.mxu1 %v2845_v21  ;;  %1719 = vmatprep.mubr.bf16.mxu0 %v128_v48  ;;  %v2896_v59 = vld [vmem:[#allocation4 + $0x1a0] ss:$8 sps:$4 sm:$0xff]   ;;  %v2899_v61 = vld [vmem:[#allocation4 + $0x194] ss:$8 sps:$4 sm:$0xff]   ;;  %v2901_v62 = vld [vmem:[#allocation4 + $0x90] ss:$8 sps:$4 sm:$0xff]  }
  0x5f   :  { %1760 = vmatprep.mubr.bf16.mxu1 %v130_v52  ;;  %v2902_v63 = vld [vmem:[#allocation4 + $0x190] ss:$8 sps:$4 sm:$0xff]   ;;  %v2903_v0 = vld [vmem:[#allocation4 + $0x84] ss:$8 sps:$4 sm:$0xff]   ;;  %v2907_v2 = vld [vmem:[#allocation4 + $0x80] ss:$8 sps:$4 sm:$0xff]  }
  0x60   :  { %1698 = vmatpush1.bf16.msra.mxu0 %v2847_v22  ;;  %v2905_v1 = vld [vmem:[#allocation4 + $0x184] ss:$8 sps:$4 sm:$0xff]   ;;  %v2908_v3 = vld [vmem:[#allocation4 + $0x180] ss:$8 sps:$4 sm:$0xff]   ;;  %v2911_v5 = vld [vmem:[#allocation4 + $0x274] ss:$8 sps:$4 sm:$0xff]  }
  0x61   :  { %1739 = vmatpush1.bf16.msra.mxu1 %v2848_v23  ;;  %1699 = vmatprep.subr.bf16.mxu0 %v2849_v24  ;;  %v113_v6 = vld [vmem:[#allocation2 + $0x10] sm:$0xff]  ;;  %v2917_v12 = vld [vmem:[#allocation4 + $0x264] ss:$8 sps:$4 sm:$0xff]   ;;  %v2915_v14 = vld [vmem:[#allocation4 + $0x260] ss:$8 sps:$4 sm:$0xff]   ;;  %vm3365_vm3 = vmmov 0  }
  0x62   :  { %1740 = vmatprep.subr.bf16.mxu1 %v2851_v25  ;;  %v2914_v7 = vld [vmem:[#allocation4 + $0x374] ss:$8 sps:$4 sm:$0xff]   ;;  %v2909_v9 = vld [vmem:[#allocation4 + $0x270] ss:$8 sps:$4 sm:$0xff]   ;;  %v129_v11 = vpack.c.bf16 %v113_v6, %v113_v6  ;;  %v2920_v13 = vld [vmem:[#allocation4 + $0x364] ss:$8 sps:$4 sm:$0xff]  }
  0x63   :  { %v2912_v10 = vld [vmem:[#allocation4 + $0x370] ss:$8 sps:$4 sm:$0xff]   ;;  %v2918_v15 = vld [vmem:[#allocation4 + $0x360] ss:$8 sps:$4 sm:$0xff]   ;;  %v2923_v16 = vld [vmem:[#allocation4 + $0x254] ss:$8 sps:$4 sm:$0xff]  }
  0x64   :  { %1700 = vmatpush1.bf16.msra.mxu0 %v2853_v26  ;;  %v2926_v17 = vld [vmem:[#allocation4 + $0x354] ss:$8 sps:$4 sm:$0xff]   ;;  %v2921_v18 = vld [vmem:[#allocation4 + $0x250] ss:$8 sps:$4 sm:$0xff]   ;;  %v2929_v20 = vld [vmem:[#allocation4 + $0x244] ss:$8 sps:$4 sm:$0xff]  }
  0x65   :  { %1741 = vmatpush1.bf16.msra.mxu1 %v2854_v27  ;;  %1701 = vmatprep.subr.bf16.mxu0 %v2855_v28  ;;  %v2924_v19 = vld [vmem:[#allocation4 + $0x350] ss:$8 sps:$4 sm:$0xff]   ;;  %v2932_v21 = vld [vmem:[#allocation4 + $0x344] ss:$8 sps:$4 sm:$0xff]   ;;  %v2927_v22 = vld [vmem:[#allocation4 + $0x240] ss:$8 sps:$4 sm:$0xff]  }
  0x66   :  { %1742 = vmatprep.subr.bf16.mxu1 %v2857_v29  ;;  %v2930_v23 = vld [vmem:[#allocation4 + $0x340] ss:$8 sps:$4 sm:$0xff]   ;;  %v2935_v24 = vld [vmem:[#allocation4 + $0x234] ss:$8 sps:$4 sm:$0xff]   ;;  %v2933_v26 = vld [vmem:[#allocation4 + $0x230] ss:$8 sps:$4 sm:$0xff]  }
  0x67   :  { %v2938_v25 = vld [vmem:[#allocation4 + $0x334] ss:$8 sps:$4 sm:$0xff]   ;;  %v2936_v27 = vld [vmem:[#allocation4 + $0x330] ss:$8 sps:$4 sm:$0xff]   ;;  %v2941_v28 = vld [vmem:[#allocation4 + $0x224] ss:$8 sps:$4 sm:$0xff]  }
  0x68   :  { %1702 = vmatpush1.bf16.msra.mxu0 %v2859_v30  ;;  %v2944_v29 = vld [vmem:[#allocation4 + $0x324] ss:$8 sps:$4 sm:$0xff]   ;;  %v2939_v30 = vld [vmem:[#allocation4 + $0x220] ss:$8 sps:$4 sm:$0xff]   ;;  %v2957_v46 = vld [vmem:[#allocation4 + $0x2f0] ss:$8 sps:$4 sm:$0xff]  }
  0x69   :  { %1743 = vmatpush1.bf16.msra.mxu1 %v2860_v31  ;;  %1703 = vmatprep.subr.bf16.mxu0 %v2861_v32  ;;  %v2942_v31 = vld [vmem:[#allocation4 + $0x320] ss:$8 sps:$4 sm:$0xff]   ;;  %v2947_v32 = vld [vmem:[#allocation4 + $0x214] ss:$8 sps:$4 sm:$0xff]   ;;  %v2965_v48 = vld [vmem:[#allocation4 + $0x2e4] ss:$8 sps:$4 sm:$0xff]  }
  0x6a   :  { %1744 = vmatprep.subr.bf16.mxu1 %v2863_v33  ;;  %v2950_v33 = vld [vmem:[#allocation4 + $0x314] ss:$8 sps:$4 sm:$0xff]   ;;  %v2968_v49 = vld [vmem:[#allocation4 + $0x3e4] ss:$8 sps:$4 sm:$0xff]   ;;  %v2993_v6 = vld [vmem:[#allocation4 + $0x290] ss:$8 sps:$4 sm:$0xff]  }
  0x6b   :  { %v2971_v52 = vld [vmem:[#allocation4 + $0x2d4] ss:$8 sps:$4 sm:$0xff]  }
  0x6c   :  { %1704 = vmatpush2.bf16.msra.mxu0 %v2865_v34  ;;  %v116_v34 = vld [vmem:[#allocation2 + $0x28] sm:$0xff]  ;;  %v2995_v4 = vld [vmem:[#allocation4 + $0x294] ss:$8 sps:$4 sm:$0xff]  }
  0x6d   :  { %1745 = vmatpush2.bf16.msra.mxu1 %v2866_v35  ;;  %1705 = vmatprep.subr.bf16.mxu0 %v2867_v36  ;;  %v2945_v35 = vld [vmem:[#allocation4 + $0x210] ss:$8 sps:$4 sm:$0xff]   ;;  %v132_v36 = vpack.c.bf16 %v116_v34, %v116_v34  ;;  %v3023_v34 = vld [vmem:[#allocation4 + $0x440] ss:$8 sps:$4 sm:$0xff]  }
  0x6e   :  { %1746 = vmatprep.subr.bf16.mxu1 %v2869_v37  ;;  %v118_v37 = vld [vmem:[#allocation2 + $0x38] sm:$0xff] }
  0x70   :  { %1706 = vmatpush2.bf16.msra.mxu0 %v2871_v38  ;;  %v2948_v38 = vld [vmem:[#allocation4 + $0x310] ss:$8 sps:$4 sm:$0xff]  }
  0x71   :  { %1747 = vmatpush2.bf16.msra.mxu1 %v2872_v39  ;;  %1707 = vmatprep.subr.bf16.mxu0 %v2873_v40  ;;  %v2953_v39 = vld [vmem:[#allocation4 + $0x204] ss:$8 sps:$4 sm:$0xff]   ;;  %v134_v40 = vpack.c.bf16 %v118_v37, %v118_v37  ;;  %v3034_v37 = vld [vmem:[#allocation4 + $0x534] ss:$8 sps:$4 sm:$0xff]  }
  0x72   :  { %1748 = vmatprep.subr.bf16.mxu1 %v2875_v41  ;;  %v2956_v41 = vld [vmem:[#allocation4 + $0x304] ss:$8 sps:$4 sm:$0xff]  }
  0x74   :  { %1708 = vmatpush2.bf16.msra.mxu0 %v2877_v42  ;;  %v2951_v42 = vld [vmem:[#allocation4 + $0x200] ss:$8 sps:$4 sm:$0xff]  }
  0x75   :  { %1749 = vmatpush2.bf16.msra.mxu1 %v2878_v43  ;;  %1709 = vmatprep.subr.bf16.mxu0 %v2879_v44  ;;  %v2954_v43 = vld [vmem:[#allocation4 + $0x300] ss:$8 sps:$4 sm:$0xff]   ;;  %v2959_v44 = vld [vmem:[#allocation4 + $0x2f4] ss:$8 sps:$4 sm:$0xff]  }
  0x76   :  { %1750 = vmatprep.subr.bf16.mxu1 %v2881_v45  ;;  %v2962_v45 = vld [vmem:[#allocation4 + $0x3f4] ss:$8 sps:$4 sm:$0xff]  }
  0x78   :  { %1710 = vmatpush2.bf16.msra.mxu0 %v2883_v47  ;;  %v2960_v47 = vld [vmem:[#allocation4 + $0x3f0] ss:$8 sps:$4 sm:$0xff]  }
  0x79   :  { %1751 = vmatpush2.bf16.msra.mxu1 %v2884_v50  ;;  %1711 = vmatprep.subr.bf16.mxu0 %v2885_v51  ;;  %v2963_v50 = vld [vmem:[#allocation4 + $0x2e0] ss:$8 sps:$4 sm:$0xff]  }
  0x7a   :  { %1752 = vmatprep.subr.bf16.mxu1 %v2887_v53  ;;  %v2966_v51 = vld [vmem:[#allocation4 + $0x3e0] ss:$8 sps:$4 sm:$0xff]   ;;  %v2974_v53 = vld [vmem:[#allocation4 + $0x3d4] ss:$8 sps:$4 sm:$0xff]  }
  0x7c   :  { %1712 = vmatpush2.bf16.msra.mxu0 %v2889_v54  ;;  %v2969_v54 = vld [vmem:[#allocation4 + $0x2d0] ss:$8 sps:$4 sm:$0xff]  }
  0x7d   :  { %1753 = vmatpush2.bf16.msra.mxu1 %v2890_v55  ;;  %1713 = vmatprep.subr.bf16.mxu0 %v2891_v56  ;;  %v2972_v55 = vld [vmem:[#allocation4 + $0x3d0] ss:$8 sps:$4 sm:$0xff]   ;;  %v2977_v56 = vld [vmem:[#allocation4 + $0x2c4] ss:$8 sps:$4 sm:$0xff]  }
  0x7e   :  { %1754 = vmatprep.subr.bf16.mxu1 %v2893_v57  ;;  %v2980_v57 = vld [vmem:[#allocation4 + $0x3c4] ss:$8 sps:$4 sm:$0xff]  }
  0x80   :  { %1714 = vmatpush2.bf16.msra.mxu0 %v2895_v58  ;;  %v2975_v58 = vld [vmem:[#allocation4 + $0x2c0] ss:$8 sps:$4 sm:$0xff]  }
  0x81   :  { %1755 = vmatpush2.bf16.msra.mxu1 %v2896_v59  ;;  %1715 = vmatprep.subr.bf16.mxu0 %v2897_v60  ;;  %v2978_v59 = vld [vmem:[#allocation4 + $0x3c0] ss:$8 sps:$4 sm:$0xff]   ;;  %v2983_v60 = vld [vmem:[#allocation4 + $0x2b4] ss:$8 sps:$4 sm:$0xff]  }
  0x82   :  { %1756 = vmatprep.subr.bf16.mxu1 %v2899_v61  ;;  %v2986_v61 = vld [vmem:[#allocation4 + $0x3b4] ss:$8 sps:$4 sm:$0xff]  }
  0x84   :  { %1716 = vmatpush2.bf16.msra.mxu0 %v2901_v62  ;;  %v2981_v62 = vld [vmem:[#allocation4 + $0x2b0] ss:$8 sps:$4 sm:$0xff]  }
  0x85   :  { %1757 = vmatpush2.bf16.msra.mxu1 %v2902_v63  ;;  %1717 = vmatprep.subr.bf16.mxu0 %v2903_v0  ;;  %v2984_v63 = vld [vmem:[#allocation4 + $0x3b0] ss:$8 sps:$4 sm:$0xff]   ;;  %v2989_v0 = vld [vmem:[#allocation4 + $0x2a4] ss:$8 sps:$4 sm:$0xff]  }
  0x86   :  { %1758 = vmatprep.subr.bf16.mxu1 %v2905_v1  ;;  %v2992_v1 = vld [vmem:[#allocation4 + $0x3a4] ss:$8 sps:$4 sm:$0xff]  }
  0x88   :  { %1718 = vmatpush2.bf16.msra.mxu0 %v2907_v2  ;;  %v2987_v2 = vld [vmem:[#allocation4 + $0x2a0] ss:$8 sps:$4 sm:$0xff]  }
  0x89   :  { %1759 = vmatpush2.bf16.msra.mxu1 %v2908_v3  ;;  %1769 = vmatprep.subr.bf16.mxu0 %v2911_v5  ;;  %v2990_v3 = vld [vmem:[#allocation4 + $0x3a0] ss:$8 sps:$4 sm:$0xff]   ;;  %v2998_v5 = vld [vmem:[#allocation4 + $0x394] ss:$8 sps:$4 sm:$0xff]  }
  0x8a   :  { %1810 = vmatprep.subr.bf16.mxu1 %v2914_v7  ;;  %v2996_v7 = vld [vmem:[#allocation4 + $0x390] ss:$8 sps:$4 sm:$0xff]  }
  0x8b   :  { %1720 = vmatmul.mubr.bf16.vlgmr.msra.gmra.mxu0 %v127_v8  ;;  %v3001_v8 = vld [vmem:[#allocation4 + $0x284] ss:$8 sps:$4 sm:$0xff]  }
  0x8c   :  { %1761 = vmatmul.mubr.bf16.vlgmr.msra.gmra.mxu1 %v129_v11  ;;  %1770 = vmatpush1.bf16.msra.mxu0 %v2909_v9  ;;  %v3004_v9 = vld [vmem:[#allocation4 + $0x384] ss:$8 sps:$4 sm:$0xff]   ;;  %v3002_v11 = vld [vmem:[#allocation4 + $0x380] ss:$8 sps:$4 sm:$0xff]  }
  0x8d   :  { %1811 = vmatpush1.bf16.msra.mxu1 %v2912_v10  ;;  %1771 = vmatprep.subr.bf16.mxu0 %v2917_v12  ;;  %v2999_v10 = vld [vmem:[#allocation4 + $0x280] ss:$8 sps:$4 sm:$0xff]  }
  0x8e   :  { %1812 = vmatprep.subr.bf16.mxu1 %v2920_v13  ;;  %1801 = vmatprep.mubr.bf16.mxu0 %v132_v36  ;;  %v115_v12 = vld [vmem:[#allocation2 + $0x20] sm:$0xff]  ;;  %v3007_v13 = vld [vmem:[#allocation4 + $0x474] ss:$8 sps:$4 sm:$0xff]  }
  0x8f   :  { %1842 = vmatprep.mubr.bf16.mxu1 %v134_v40  ;;  %v3031_v36 = vld [vmem:[#allocation4 + $0x434] ss:$8 sps:$4 sm:$0xff]   ;;  %v3037_v40 = vld [vmem:[#allocation4 + $0x424] ss:$8 sps:$4 sm:$0xff]  }
  0x90   :  { %1772 = vmatpush1.bf16.msra.mxu0 %v2915_v14  ;;  %v117_v14 = vld [vmem:[#allocation2 + $0x30] sm:$0xff] }
  0x91   :  { %1813 = vmatpush1.bf16.msra.mxu1 %v2918_v15  ;;  %1773 = vmatprep.subr.bf16.mxu0 %v2923_v16  ;;  %v3010_v15 = vld [vmem:[#allocation4 + $0x574] ss:$8 sps:$4 sm:$0xff]   ;;  %v131_v16 = vpack.c.bf16 %v115_v12, %v115_v12 }
  0x92   :  { %1814 = vmatprep.subr.bf16.mxu1 %v2926_v17  ;;  %v3005_v17 = vld [vmem:[#allocation4 + $0x470] ss:$8 sps:$4 sm:$0xff]   ;;  %v3091_v12 = vld [vmem:[#allocation4 + $0x494] ss:$8 sps:$4 sm:$0xff]  }
  0x94   :  { %1774 = vmatpush1.bf16.msra.mxu0 %v2921_v18  ;;  %v3008_v18 = vld [vmem:[#allocation4 + $0x570] ss:$8 sps:$4 sm:$0xff]  }
  0x95   :  { %1815 = vmatpush1.bf16.msra.mxu1 %v2924_v19  ;;  %1775 = vmatprep.subr.bf16.mxu0 %v2929_v20  ;;  %v133_v19 = vpack.c.bf16 %v117_v14, %v117_v14  ;;  %v3013_v20 = vld [vmem:[#allocation4 + $0x464] ss:$8 sps:$4 sm:$0xff]   ;;  %v3089_v14 = vld [vmem:[#allocation4 + $0x490] ss:$8 sps:$4 sm:$0xff]  }
  0x96   :  { %1816 = vmatprep.subr.bf16.mxu1 %v2932_v21  ;;  %v3016_v21 = vld [vmem:[#allocation4 + $0x564] ss:$8 sps:$4 sm:$0xff]  }
  0x98   :  { %1776 = vmatpush1.bf16.msra.mxu0 %v2927_v22  ;;  %v120_v22 = vld [vmem:[#allocation2 + $0x48] sm:$0xff] }
  0x99   :  { %1817 = vmatpush1.bf16.msra.mxu1 %v2930_v23  ;;  %1777 = vmatprep.subr.bf16.mxu0 %v2935_v24  ;;  %v3011_v23 = vld [vmem:[#allocation4 + $0x460] ss:$8 sps:$4 sm:$0xff]   ;;  %v136_v24 = vpack.c.bf16 %v120_v22, %v120_v22  ;;  %v3103_v22 = vld [vmem:[#allocation4 + $0x674] ss:$8 sps:$4 sm:$0xff]  }
  0x9a   :  { %1818 = vmatprep.subr.bf16.mxu1 %v2938_v25  ;;  %v122_v25 = vld [vmem:[#allocation2 + $0x58] sm:$0xff] }
  0x9c   :  { %1778 = vmatpush1.bf16.msra.mxu0 %v2933_v26  ;;  %v3014_v26 = vld [vmem:[#allocation4 + $0x560] ss:$8 sps:$4 sm:$0xff]  }
  0x9d   :  { %1819 = vmatpush1.bf16.msra.mxu1 %v2936_v27  ;;  %1779 = vmatprep.subr.bf16.mxu0 %v2941_v28  ;;  %v3019_v27 = vld [vmem:[#allocation4 + $0x454] ss:$8 sps:$4 sm:$0xff]   ;;  %v138_v28 = vpack.c.bf16 %v122_v25, %v122_v25  ;;  %v124_v25 = vld [vmem:[#allocation2 + $0x68] sm:$0xff] }
  0x9e   :  { %1820 = vmatprep.subr.bf16.mxu1 %v2944_v29  ;;  %v3022_v29 = vld [vmem:[#allocation4 + $0x554] ss:$8 sps:$4 sm:$0xff]  }
  0xa0   :  { %1780 = vmatpush1.bf16.msra.mxu0 %v2939_v30  ;;  %v3017_v30 = vld [vmem:[#allocation4 + $0x450] ss:$8 sps:$4 sm:$0xff]  }
  0xa1   :  { %1821 = vmatpush1.bf16.msra.mxu1 %v2942_v31  ;;  %1781 = vmatprep.subr.bf16.mxu0 %v2947_v32  ;;  %v3020_v31 = vld [vmem:[#allocation4 + $0x550] ss:$8 sps:$4 sm:$0xff]   ;;  %v3025_v32 = vld [vmem:[#allocation4 + $0x444] ss:$8 sps:$4 sm:$0xff]  }
  0xa2   :  { %1822 = vmatprep.subr.bf16.mxu1 %v2950_v33  ;;  %v3028_v33 = vld [vmem:[#allocation4 + $0x544] ss:$8 sps:$4 sm:$0xff]  }
  0xa4   :  { %1782 = vmatpush1.bf16.msra.mxu0 %v2945_v35  ;;  %v3026_v35 = vld [vmem:[#allocation4 + $0x540] ss:$8 sps:$4 sm:$0xff]  }
  0xa5   :  { %1823 = vmatpush1.bf16.msra.mxu1 %v2948_v38  ;;  %1783 = vmatprep.subr.bf16.mxu0 %v2953_v39  ;;  %v3029_v38 = vld [vmem:[#allocation4 + $0x430] ss:$8 sps:$4 sm:$0xff]  }
  0xa6   :  { %1824 = vmatprep.subr.bf16.mxu1 %v2956_v41  ;;  %v3032_v39 = vld [vmem:[#allocation4 + $0x530] ss:$8 sps:$4 sm:$0xff]   ;;  %v3040_v41 = vld [vmem:[#allocation4 + $0x524] ss:$8 sps:$4 sm:$0xff]  }
  0xa8   :  { %1784 = vmatpush1.bf16.msra.mxu0 %v2951_v42  ;;  %v3035_v42 = vld [vmem:[#allocation4 + $0x420] ss:$8 sps:$4 sm:$0xff]  }
  0xa9   :  { %1825 = vmatpush1.bf16.msra.mxu1 %v2954_v43  ;;  %1785 = vmatprep.subr.bf16.mxu0 %v2959_v44  ;;  %v3038_v43 = vld [vmem:[#allocation4 + $0x520] ss:$8 sps:$4 sm:$0xff]   ;;  %v3043_v44 = vld [vmem:[#allocation4 + $0x414] ss:$8 sps:$4 sm:$0xff]  }
  0xaa   :  { %1826 = vmatprep.subr.bf16.mxu1 %v2962_v45  ;;  %v3046_v45 = vld [vmem:[#allocation4 + $0x514] ss:$8 sps:$4 sm:$0xff]  }
  0xac   :  { %1786 = vmatpush2.bf16.msra.mxu0 %v2957_v46  ;;  %v3041_v46 = vld [vmem:[#allocation4 + $0x410] ss:$8 sps:$4 sm:$0xff]  }
  0xad   :  { %1827 = vmatpush2.bf16.msra.mxu1 %v2960_v47  ;;  %1787 = vmatprep.subr.bf16.mxu0 %v2965_v48  ;;  %v3044_v47 = vld [vmem:[#allocation4 + $0x510] ss:$8 sps:$4 sm:$0xff]   ;;  %v3049_v48 = vld [vmem:[#allocation4 + $0x404] ss:$8 sps:$4 sm:$0xff]  }
  0xae   :  { %1828 = vmatprep.subr.bf16.mxu1 %v2968_v49  ;;  %v3052_v49 = vld [vmem:[#allocation4 + $0x504] ss:$8 sps:$4 sm:$0xff]  }
  0xb0   :  { %1788 = vmatpush2.bf16.msra.mxu0 %v2963_v50  ;;  %v3047_v50 = vld [vmem:[#allocation4 + $0x400] ss:$8 sps:$4 sm:$0xff]  }
  0xb1   :  { %1829 = vmatpush2.bf16.msra.mxu1 %v2966_v51  ;;  %1789 = vmatprep.subr.bf16.mxu0 %v2971_v52  ;;  %v3050_v51 = vld [vmem:[#allocation4 + $0x500] ss:$8 sps:$4 sm:$0xff]   ;;  %v3055_v52 = vld [vmem:[#allocation4 + $0x4f4] ss:$8 sps:$4 sm:$0xff]  }
  0xb2   :  { %1830 = vmatprep.subr.bf16.mxu1 %v2974_v53  ;;  %v3058_v53 = vld [vmem:[#allocation4 + $0x5f4] ss:$8 sps:$4 sm:$0xff]  }
  0xb4   :  { %1790 = vmatpush2.bf16.msra.mxu0 %v2969_v54  ;;  %v3053_v54 = vld [vmem:[#allocation4 + $0x4f0] ss:$8 sps:$4 sm:$0xff]  }
  0xb5   :  { %1831 = vmatpush2.bf16.msra.mxu1 %v2972_v55  ;;  %1791 = vmatprep.subr.bf16.mxu0 %v2977_v56  ;;  %v3056_v55 = vld [vmem:[#allocation4 + $0x5f0] ss:$8 sps:$4 sm:$0xff]   ;;  %v3061_v56 = vld [vmem:[#allocation4 + $0x4e4] ss:$8 sps:$4 sm:$0xff]  }
  0xb6   :  { %1832 = vmatprep.subr.bf16.mxu1 %v2980_v57  ;;  %v3064_v57 = vld [vmem:[#allocation4 + $0x5e4] ss:$8 sps:$4 sm:$0xff]  }
  0xb8   :  { %1792 = vmatpush2.bf16.msra.mxu0 %v2975_v58  ;;  %v3059_v58 = vld [vmem:[#allocation4 + $0x4e0] ss:$8 sps:$4 sm:$0xff]  }
  0xb9   :  { %1833 = vmatpush2.bf16.msra.mxu1 %v2978_v59  ;;  %1793 = vmatprep.subr.bf16.mxu0 %v2983_v60  ;;  %v3062_v59 = vld [vmem:[#allocation4 + $0x5e0] ss:$8 sps:$4 sm:$0xff]   ;;  %v3067_v60 = vld [vmem:[#allocation4 + $0x4d4] ss:$8 sps:$4 sm:$0xff]  }
  0xba   :  { %1834 = vmatprep.subr.bf16.mxu1 %v2986_v61  ;;  %v3070_v61 = vld [vmem:[#allocation4 + $0x5d4] ss:$8 sps:$4 sm:$0xff]  }
  0xbc   :  { %1794 = vmatpush2.bf16.msra.mxu0 %v2981_v62  ;;  %v3065_v62 = vld [vmem:[#allocation4 + $0x4d0] ss:$8 sps:$4 sm:$0xff]  }
  0xbd   :  { %1835 = vmatpush2.bf16.msra.mxu1 %v2984_v63  ;;  %1795 = vmatprep.subr.bf16.mxu0 %v2989_v0  ;;  %v3068_v63 = vld [vmem:[#allocation4 + $0x5d0] ss:$8 sps:$4 sm:$0xff]   ;;  %v3073_v0 = vld [vmem:[#allocation4 + $0x4c4] ss:$8 sps:$4 sm:$0xff]  }
  0xbe   :  { %1836 = vmatprep.subr.bf16.mxu1 %v2992_v1  ;;  %v3076_v1 = vld [vmem:[#allocation4 + $0x5c4] ss:$8 sps:$4 sm:$0xff]  }
  0xc0   :  { %1796 = vmatpush2.bf16.msra.mxu0 %v2987_v2  ;;  %v3071_v2 = vld [vmem:[#allocation4 + $0x4c0] ss:$8 sps:$4 sm:$0xff]  }
  0xc1   :  { %1837 = vmatpush2.bf16.msra.mxu1 %v2990_v3  ;;  %1797 = vmatprep.subr.bf16.mxu0 %v2995_v4  ;;  %v3074_v3 = vld [vmem:[#allocation4 + $0x5c0] ss:$8 sps:$4 sm:$0xff]   ;;  %v3079_v4 = vld [vmem:[#allocation4 + $0x4b4] ss:$8 sps:$4 sm:$0xff]  }
  0xc2   :  { %1838 = vmatprep.subr.bf16.mxu1 %v2998_v5  ;;  %v3082_v5 = vld [vmem:[#allocation4 + $0x5b4] ss:$8 sps:$4 sm:$0xff]  }
  0xc4   :  { %1798 = vmatpush2.bf16.msra.mxu0 %v2993_v6  ;;  %v3077_v6 = vld [vmem:[#allocation4 + $0x4b0] ss:$8 sps:$4 sm:$0xff]  }
  0xc5   :  { %1839 = vmatpush2.bf16.msra.mxu1 %v2996_v7  ;;  %1799 = vmatprep.subr.bf16.mxu0 %v3001_v8  ;;  %v3080_v7 = vld [vmem:[#allocation4 + $0x5b0] ss:$8 sps:$4 sm:$0xff]   ;;  %v3085_v8 = vld [vmem:[#allocation4 + $0x4a4] ss:$8 sps:$4 sm:$0xff]  }
  0xc6   :  { %1840 = vmatprep.subr.bf16.mxu1 %v3004_v9  ;;  %v3088_v9 = vld [vmem:[#allocation4 + $0x5a4] ss:$8 sps:$4 sm:$0xff]  }
  0xc8   :  { %1800 = vmatpush2.bf16.msra.mxu0 %v2999_v10  ;;  %v3083_v10 = vld [vmem:[#allocation4 + $0x4a0] ss:$8 sps:$4 sm:$0xff]  }
  0xc9   :  { %1841 = vmatpush2.bf16.msra.mxu1 %v3002_v11  ;;  %1851 = vmatprep.subr.bf16.mxu0 %v3007_v13  ;;  %v3086_v11 = vld [vmem:[#allocation4 + $0x5a0] ss:$8 sps:$4 sm:$0xff]   ;;  %v3094_v13 = vld [vmem:[#allocation4 + $0x594] ss:$8 sps:$4 sm:$0xff]  }
  0xca   :  { %1892 = vmatprep.subr.bf16.mxu1 %v3010_v15  ;;  %v3092_v15 = vld [vmem:[#allocation4 + $0x590] ss:$8 sps:$4 sm:$0xff]  }
  0xcb   :  { %1802 = vmatmul.mubr.bf16.vlgmr.msra.gmra.mxu0 %v131_v16  ;;  %v3097_v16 = vld [vmem:[#allocation4 + $0x484] ss:$8 sps:$4 sm:$0xff]  }
  0xcc   :  { %1843 = vmatmul.mubr.bf16.vlgmr.msra.gmra.mxu1 %v133_v19  ;;  %1852 = vmatpush1.bf16.msra.mxu0 %v3005_v17  ;;  %v3100_v17 = vld [vmem:[#allocation4 + $0x584] ss:$8 sps:$4 sm:$0xff]   ;;  %v3098_v19 = vld [vmem:[#allocation4 + $0x580] ss:$8 sps:$4 sm:$0xff]  }
  0xcd   :  { %1893 = vmatpush1.bf16.msra.mxu1 %v3008_v18  ;;  %1853 = vmatprep.subr.bf16.mxu0 %v3013_v20  ;;  %v3095_v18 = vld [vmem:[#allocation4 + $0x480] ss:$8 sps:$4 sm:$0xff]  }
  0xce   :  { %1894 = vmatprep.subr.bf16.mxu1 %v3016_v21  ;;  %1883 = vmatprep.mubr.bf16.mxu0 %v136_v24  ;;  %v119_v20 = vld [vmem:[#allocation2 + $0x40] sm:$0xff]  ;;  %v121_v21 = vld [vmem:[#allocation2 + $0x50] sm:$0xff]  ;;  %v126_v24 = vld [vmem:[#allocation2 + $0x78] sm:$0xff] }
  0xcf   :  { %1924 = vmatprep.mubr.bf16.mxu1 %v138_v28  ;;  %v135_v28 = vpack.c.bf16 %v119_v20, %v119_v20  ;;  %v3172_v20 = vld [vmem:[#allocation4 + $0x6b0] ss:$8 sps:$4 sm:$0xff]  }
  0xd0   :  { %1854 = vmatpush1.bf16.msra.mxu0 %v3011_v23  ;;  %v3106_v23 = vld [vmem:[#allocation4 + $0x774] ss:$8 sps:$4 sm:$0xff]  }
  0xd1   :  { %1895 = vmatpush1.bf16.msra.mxu1 %v3014_v26  ;;  %1855 = vmatprep.subr.bf16.mxu0 %v3019_v27  ;;  %v3101_v26 = vld [vmem:[#allocation4 + $0x670] ss:$8 sps:$4 sm:$0xff]  }
  0xd2   :  { %1896 = vmatprep.subr.bf16.mxu1 %v3022_v29  ;;  %v3104_v27 = vld [vmem:[#allocation4 + $0x770] ss:$8 sps:$4 sm:$0xff]   ;;  %v137_v29 = vpack.c.bf16 %v121_v21, %v121_v21  ;;  %v3175_v21 = vld [vmem:[#allocation4 + $0x7a0] ss:$8 sps:$4 sm:$0xff]  }
  0xd4   :  { %1856 = vmatpush1.bf16.msra.mxu0 %v3017_v30  ;;  %v3109_v30 = vld [vmem:[#allocation4 + $0x664] ss:$8 sps:$4 sm:$0xff]  }
  0xd5   :  { %1897 = vmatpush1.bf16.msra.mxu1 %v3020_v31  ;;  %1857 = vmatprep.subr.bf16.mxu0 %v3025_v32  ;;  %v3112_v31 = vld [vmem:[#allocation4 + $0x764] ss:$8 sps:$4 sm:$0xff]   ;;  %v142_v32 = vpack.c.bf16 %v126_v24, %v126_v24  ;;  %v3178_v24 = vld [vmem:[#allocation4 + $0x6a0] ss:$8 sps:$4 sm:$0xff]  }
  0xd6   :  { %1898 = vmatprep.subr.bf16.mxu1 %v3028_v33  ;;  %v140_v33 = vpack.c.bf16 %v124_v25, %v124_v25  ;;  %v3181_v25 = vld [vmem:[#allocation4 + $0x790] ss:$8 sps:$4 sm:$0xff]  }
  0xd8   :  { %1858 = vmatpush1.bf16.msra.mxu0 %v3023_v34  ;;  %v3107_v34 = vld [vmem:[#allocation4 + $0x660] ss:$8 sps:$4 sm:$0xff]  }
  0xd9   :  { %1899 = vmatpush1.bf16.msra.mxu1 %v3026_v35  ;;  %1859 = vmatprep.subr.bf16.mxu0 %v3031_v36  ;;  %v3110_v35 = vld [vmem:[#allocation4 + $0x760] ss:$8 sps:$4 sm:$0xff]   ;;  %v3115_v36 = vld [vmem:[#allocation4 + $0x654] ss:$8 sps:$4 sm:$0xff]  }
  0xda   :  { %1900 = vmatprep.subr.bf16.mxu1 %v3034_v37  ;;  %v3118_v37 = vld [vmem:[#allocation4 + $0x754] ss:$8 sps:$4 sm:$0xff]  }
  0xdc   :  { %1860 = vmatpush1.bf16.msra.mxu0 %v3029_v38  ;;  %v3113_v38 = vld [vmem:[#allocation4 + $0x650] ss:$8 sps:$4 sm:$0xff]  }
  0xdd   :  { %1901 = vmatpush1.bf16.msra.mxu1 %v3032_v39  ;;  %1861 = vmatprep.subr.bf16.mxu0 %v3037_v40  ;;  %v3116_v39 = vld [vmem:[#allocation4 + $0x750] ss:$8 sps:$4 sm:$0xff]   ;;  %v3121_v40 = vld [vmem:[#allocation4 + $0x644] ss:$8 sps:$4 sm:$0xff]  }
  0xde   :  { %1902 = vmatprep.subr.bf16.mxu1 %v3040_v41  ;;  %v3124_v41 = vld [vmem:[#allocation4 + $0x744] ss:$8 sps:$4 sm:$0xff]  }
  0xe0   :  { %1862 = vmatpush1.bf16.msra.mxu0 %v3035_v42  ;;  %v3119_v42 = vld [vmem:[#allocation4 + $0x640] ss:$8 sps:$4 sm:$0xff]  }
  0xe1   :  { %1903 = vmatpush1.bf16.msra.mxu1 %v3038_v43  ;;  %1863 = vmatprep.subr.bf16.mxu0 %v3043_v44  ;;  %v3122_v43 = vld [vmem:[#allocation4 + $0x740] ss:$8 sps:$4 sm:$0xff]   ;;  %v3127_v44 = vld [vmem:[#allocation4 + $0x634] ss:$8 sps:$4 sm:$0xff]  }
  0xe2   :  { %1904 = vmatprep.subr.bf16.mxu1 %v3046_v45  ;;  %v3130_v45 = vld [vmem:[#allocation4 + $0x734] ss:$8 sps:$4 sm:$0xff]  }
  0xe4   :  { %1864 = vmatpush1.bf16.msra.mxu0 %v3041_v46  ;;  %v3125_v46 = vld [vmem:[#allocation4 + $0x630] ss:$8 sps:$4 sm:$0xff]  }
  0xe5   :  { %1905 = vmatpush1.bf16.msra.mxu1 %v3044_v47  ;;  %1865 = vmatprep.subr.bf16.mxu0 %v3049_v48  ;;  %v3128_v47 = vld [vmem:[#allocation4 + $0x730] ss:$8 sps:$4 sm:$0xff]   ;;  %v3133_v48 = vld [vmem:[#allocation4 + $0x624] ss:$8 sps:$4 sm:$0xff]  }
  0xe6   :  { %1906 = vmatprep.subr.bf16.mxu1 %v3052_v49  ;;  %v3136_v49 = vld [vmem:[#allocation4 + $0x724] ss:$8 sps:$4 sm:$0xff]  }
  0xe8   :  { %1866 = vmatpush1.bf16.msra.mxu0 %v3047_v50  ;;  %v3131_v50 = vld [vmem:[#allocation4 + $0x620] ss:$8 sps:$4 sm:$0xff]  }
  0xe9   :  { %1907 = vmatpush1.bf16.msra.mxu1 %v3050_v51  ;;  %1867 = vmatprep.subr.bf16.mxu0 %v3055_v52  ;;  %v3134_v51 = vld [vmem:[#allocation4 + $0x720] ss:$8 sps:$4 sm:$0xff]   ;;  %v3139_v52 = vld [vmem:[#allocation4 + $0x614] ss:$8 sps:$4 sm:$0xff]  }
  0xea   :  { %1908 = vmatprep.subr.bf16.mxu1 %v3058_v53  ;;  %v3142_v53 = vld [vmem:[#allocation4 + $0x714] ss:$8 sps:$4 sm:$0xff]  }
  0xec   :  { %1868 = vmatpush2.bf16.msra.mxu0 %v3053_v54  ;;  %v395_v54 = vld [vmem:[#allocation4 + $0x7e0] sm:$0x33] }
  0xed   :  { %1909 = vmatpush2.bf16.msra.mxu1 %v3056_v55  ;;  %1869 = vmatprep.subr.bf16.mxu0 %v3061_v56  ;;  %v3363_v55 = vmov 65535  }
  0xee   :  { %1910 = vmatprep.subr.bf16.mxu1 %v3064_v57  ;;  %v1679_v56 = vsel %vm1677_vm1, 4294967295, %v3363_v55  ;;  %v3137_v57 = vld [vmem:[#allocation4 + $0x610] ss:$8 sps:$4 sm:$0xff]   ;;  %v3193_v55 = vld [vmem:[#allocation7 + $0x78] sm:$0xff]  }
  0xf0   :  { %1870 = vmatpush2.bf16.msra.mxu0 %v3059_v58  ;;  %v3140_v58 = vld [vmem:[#allocation4 + $0x710] ss:$8 sps:$4 sm:$0xff]  }
  0xf1   :  { %1911 = vmatpush2.bf16.msra.mxu1 %v3062_v59  ;;  %1871 = vmatprep.subr.bf16.mxu0 %v3067_v60  ;;  %v3145_v59 = vld [vmem:[#allocation4 + $0x604] ss:$8 sps:$4 sm:$0xff]  }
  0xf2   :  { %1912 = vmatprep.subr.bf16.mxu1 %v3070_v61  ;;  %v3148_v60 = vld [vmem:[#allocation4 + $0x704] ss:$8 sps:$4 sm:$0xff]   ;;  %v2683_v61 = vcombine.high %v395_v54, %v395_v54 }
  0xf4   :  { %1872 = vmatpush2.bf16.msra.mxu0 %v3065_v62  ;;  %v1680_v62 = vsel %vm1678_vm2, %v1679_v56, 0  ;;  %v3194_v56 = vld [vmem:[#allocation7 + $0x38] sm:$0xff]  }
  0xf5   :  { %1913 = vmatpush2.bf16.msra.mxu1 %v3068_v63  ;;  %1873 = vmatprep.subr.bf16.mxu0 %v3073_v0  ;;  %v3143_v63 = vld [vmem:[#allocation4 + $0x600] ss:$8 sps:$4 sm:$0xff]  }
  0xf6   :  { %1914 = vmatprep.subr.bf16.mxu1 %v3076_v1  ;;  %v3146_v0 = vld [vmem:[#allocation4 + $0x700] ss:$8 sps:$4 sm:$0xff]   ;;  %v2682_v1 = vcombine.low %v395_v54, %v395_v54 }
  0xf8   :  { %1874 = vmatpush2.bf16.msra.mxu0 %v3071_v2  ;;  %v3151_v2 = vld [vmem:[#allocation4 + $0x6f4] ss:$8 sps:$4 sm:$0xff]  }
  0xf9   :  { %1915 = vmatpush2.bf16.msra.mxu1 %v3074_v3  ;;  %1875 = vmatprep.subr.bf16.mxu0 %v3079_v4  ;;  %v1685_v3 = vand.u32 %v2683_v61, %v1680_v62  ;;  %v3149_v4 = vld [vmem:[#allocation4 + $0x6f0] ss:$8 sps:$4 sm:$0xff]  }
  0xfa   :  { %1916 = vmatprep.subr.bf16.mxu1 %v3082_v5  ;;  %v1682_v5 = vand.u32 %v2682_v1, %v1680_v62  ;;  %v3199_v61 = vld [vmem:[#allocation7 + $0x60] sm:$0xff]   ;;  %v3203_v1 = vld [vmem:[#allocation7 + $0x50] sm:$0xff]  }
  0xfb   :  { %v3200_v62 = vld [vmem:[#allocation7 + $0x20] sm:$0xff]  }
  0xfc   :  { %1876 = vmatpush2.bf16.msra.mxu0 %v3077_v6  ;;  %v3156_v6 = vld [vmem:[#allocation4 + $0x6e4] ss:$8 sps:$4 sm:$0xff]  }
  0xfd   :  { %1917 = vmatpush2.bf16.msra.mxu1 %v3080_v7  ;;  %1877 = vmatprep.subr.bf16.mxu0 %v3085_v8  ;;  %v3159_v7 = vld [vmem:[#allocation4 + $0x7d4] ss:$8 sps:$4 sm:$0xff]   ;;  %v3154_v8 = vld [vmem:[#allocation4 + $0x6e0] ss:$8 sps:$4 sm:$0xff]  }
  0xfe   :  { %1918 = vmatprep.subr.bf16.mxu1 %v3088_v9  ;;  %v3157_v9 = vld [vmem:[#allocation4 + $0x7d0] ss:$8 sps:$4 sm:$0xff]  }
 0x100   :  { %1878 = vmatpush2.bf16.msra.mxu0 %v3083_v10  ;;  %v3162_v10 = vld [vmem:[#allocation4 + $0x6d4] ss:$8 sps:$4 sm:$0xff]  }
 0x101   :  { %1919 = vmatpush2.bf16.msra.mxu1 %v3086_v11  ;;  %1879 = vmatprep.subr.bf16.mxu0 %v3091_v12  ;;  %v3165_v11 = vld [vmem:[#allocation4 + $0x7c4] ss:$8 sps:$4 sm:$0xff]   ;;  %v3160_v12 = vld [vmem:[#allocation4 + $0x6d0] ss:$8 sps:$4 sm:$0xff]  }
 0x102   :  { %1920 = vmatprep.subr.bf16.mxu1 %v3094_v13  ;;  %v3163_v13 = vld [vmem:[#allocation4 + $0x7c0] ss:$8 sps:$4 sm:$0xff]  }
 0x104   :  { %1880 = vmatpush2.bf16.msra.mxu0 %v3089_v14  ;;  %v3168_v14 = vld [vmem:[#allocation4 + $0x6c4] ss:$8 sps:$4 sm:$0xff]  }
 0x105   :  { %1921 = vmatpush2.bf16.msra.mxu1 %v3092_v15  ;;  %1881 = vmatprep.subr.bf16.mxu0 %v3097_v16  ;;  %v3171_v15 = vld [vmem:[#allocation4 + $0x7b4] ss:$8 sps:$4 sm:$0xff]   ;;  %v3166_v16 = vld [vmem:[#allocation4 + $0x6c0] ss:$8 sps:$4 sm:$0xff]  }
 0x106   :  { %1922 = vmatprep.subr.bf16.mxu1 %v3100_v17  ;;  %v3169_v17 = vld [vmem:[#allocation4 + $0x7b0] ss:$8 sps:$4 sm:$0xff]  }
 0x108   :  { %1882 = vmatpush2.bf16.msra.mxu0 %v3095_v18  ;;  %v3174_v18 = vld [vmem:[#allocation4 + $0x6b4] ss:$8 sps:$4 sm:$0xff]  }
 0x109   :  { %1923 = vmatpush2.bf16.msra.mxu1 %v3098_v19  ;;  %1933 = vmatprep.subr.bf16.mxu0 %v3103_v22  ;;  %v3177_v19 = vld [vmem:[#allocation4 + $0x7a4] ss:$8 sps:$4 sm:$0xff]  }
 0x10a   :  { %1974 = vmatprep.subr.bf16.mxu1 %v3106_v23  ;;  %v3180_v22 = vld [vmem:[#allocation4 + $0x6a4] ss:$8 sps:$4 sm:$0xff]   ;;  %v3183_v23 = vld [vmem:[#allocation4 + $0x794] ss:$8 sps:$4 sm:$0xff]  }
 0x10b   :  { %1884 = vmatmul.mubr.bf16.vlgmr.msra.gmra.mxu0 %v135_v28  ;;  %v3189_v28 = vld [vmem:[#allocation4 + $0x784] ss:$8 sps:$4 sm:$0xff]  }
 0x10c   :  { %1925 = vmatmul.mubr.bf16.vlgmr.msra.gmra.mxu1 %v137_v29  ;;  %1934 = vmatpush1.bf16.msra.mxu0 %v3101_v26  ;;  %v398_v26 = vlaneseq  ;;  %v3184_v29 = vld [vmem:[#allocation4 + $0x690] ss:$8 sps:$4 sm:$0xff]  }
 0x10d   :  { %1975 = vmatpush1.bf16.msra.mxu1 %v3104_v27  ;;  %1935 = vmatprep.subr.bf16.mxu0 %v3109_v30  ;;  %v3186_v27 = vld [vmem:[#allocation4 + $0x694] ss:$8 sps:$4 sm:$0xff]   ;;  %v3187_v30 = vld [vmem:[#allocation4 + $0x780] ss:$8 sps:$4 sm:$0xff]  }
 0x10e   :  { %1976 = vmatprep.subr.bf16.mxu1 %v3112_v31  ;;  %2684 = vmatprep.mubr.msk.bf16.mxu1 %vm1673_vm0, %v142_v32  ;;  %v125_v31 = vld [vmem:[#allocation2 + $0x70] sm:$0xff]  ;;  %v399_v32 = vshrl.u32 %v398_v26, 7 }
 0x10f   :  { %1965 = vmatprep.mubr.bf16.mxu0 %v140_v33  ;;  %v3192_v33 = vld [vmem:[#allocation4 + $0x684] ss:$8 sps:$4 sm:$0xff]  }
 0x110   :  { %1936 = vmatpush1.bf16.msra.mxu0 %v3107_v34  ;;  %v141_v34 = vpack.c.bf16 %v125_v31, %v125_v31 }
 0x111   :  { %1977 = vmatpush1.bf16.msra.mxu1 %v3110_v35  ;;  %1937 = vmatprep.subr.bf16.mxu0 %v3115_v36  ;;  %v3190_v35 = vld [vmem:[#allocation4 + $0x680] ss:$8 sps:$4 sm:$0xff]   ;;  %v400_v36 = vsub.s32 0, %v399_v32 }
 0x112   :  { %1978 = vmatprep.subr.bf16.mxu1 %v3118_v37  ;;  %v123_v37 = vld [vmem:[#allocation2 + $0x60] sm:$0xff] }
 0x114   :  { %1938 = vmatpush1.bf16.msra.mxu0 %v3113_v38  ;;  %v396_v38 = vld [vmem:[#allocation6] sm:$0x3] }
 0x115   :  { %1979 = vmatpush1.bf16.msra.mxu1 %v3116_v39  ;;  %1939 = vmatprep.subr.bf16.mxu0 %v3121_v40  ;;  %v404_v39 = vsub.s32 1, %v399_v32  ;;  %v139_v40 = vpack.c.bf16 %v123_v37, %v123_v37 }
 0x116   :  { %1980 = vmatprep.subr.bf16.mxu1 %v3124_v41  ;;  %v401_v41 = vrot.slane %v396_v38, %v400_v36 }
 0x118   :  { %1940 = vmatpush1.bf16.msra.mxu0 %v3119_v42  ;;  %v405_v42 = vrot.slane %v396_v38, %v404_v39 }
 0x119   :  { %1981 = vmatpush1.bf16.msra.mxu1 %v3122_v43  ;;  %1941 = vmatprep.subr.bf16.mxu0 %v3127_v44 }
 0x11a   :  { %1982 = vmatprep.subr.bf16.mxu1 %v3130_v45 }
 0x11c   :  { %1942 = vmatpush1.bf16.msra.mxu0 %v3125_v46 }
 0x11d   :  { %1983 = vmatpush1.bf16.msra.mxu1 %v3128_v47  ;;  %1943 = vmatprep.subr.bf16.mxu0 %v3133_v48 }
 0x11e   :  { %1984 = vmatprep.subr.bf16.mxu1 %v3136_v49 }
 0x120   :  { %1944 = vmatpush1.bf16.msra.mxu0 %v3131_v50 }
 0x121   :  { %1985 = vmatpush1.bf16.msra.mxu1 %v3134_v51  ;;  %1945 = vmatprep.subr.bf16.mxu0 %v3139_v52 }
 0x122   :  { %1986 = vmatprep.subr.bf16.mxu1 %v3142_v53 }
 0x124   :  { %1946 = vmatpush1.bf16.msra.mxu0 %v3137_v57  ;;  %v3195_v57 = vld [vmem:[#allocation7 + $0x70] sm:$0xff]  }
 0x125   :  { %1987 = vmatpush1.bf16.msra.mxu1 %v3140_v58  ;;  %1947 = vmatprep.subr.bf16.mxu0 %v3145_v59  ;;  %v3196_v58 = vld [vmem:[#allocation7 + $0x30] sm:$0xff]   ;;  %v3197_v59 = vld [vmem:[#allocation7 + $0x68] sm:$0xff]  }
 0x126   :  { %1988 = vmatprep.subr.bf16.mxu1 %v3148_v60  ;;  %v3198_v60 = vld [vmem:[#allocation7 + $0x28] sm:$0xff]  }
 0x128   :  { %1948 = vmatpush1.bf16.msra.mxu0 %v3143_v63  ;;  %v3201_v63 = vld [vmem:[#allocation7 + $0x58] sm:$0xff]  }
 0x129   :  { %1989 = vmatpush1.bf16.msra.mxu1 %v3146_v0  ;;  %1949 = vmatprep.subr.bf16.mxu0 %v3151_v2  ;;  %v3202_v0 = vld [vmem:[#allocation7 + $0x18] sm:$0xff]   ;;  %v3204_v2 = vld [vmem:[#allocation7 + $0x10] sm:$0xff]  }
 0x12a   :  { %1992 = vmatprep.subr.bf16.mxu1 %v1685_v3 }
 0x12c   :  { %1950 = vmatpush2.bf16.msra.mxu0 %v3149_v4 }
 0x12d   :  { %1993 = vmatpush2.bf16.msra.mxu1 %v1682_v5  ;;  %1951 = vmatprep.subr.bf16.mxu0 %v3156_v6 }
 0x12e   :  { %1994 = vmatprep.subr.bf16.mxu1 %v3159_v7 }
 0x130   :  { %1952 = vmatpush2.bf16.msra.mxu0 %v3154_v8  ;;  %v3205_v8 = vld [vmem:[#allocation7 + $0x48] sm:$0xff]  }
 0x131   :  { %1995 = vmatpush2.bf16.msra.mxu1 %v3157_v9  ;;  %1953 = vmatprep.subr.bf16.mxu0 %v3162_v10 }
 0x132   :  { %1996 = vmatprep.subr.bf16.mxu1 %v3165_v11  ;;  %v3206_v11 = vld [vmem:[#allocation7 + $0x8] sm:$0xff]  }
 0x134   :  { %1954 = vmatpush2.bf16.msra.mxu0 %v3160_v12 }
 0x135   :  { %1997 = vmatpush2.bf16.msra.mxu1 %v3163_v13  ;;  %1955 = vmatprep.subr.bf16.mxu0 %v3168_v14 }
 0x136   :  { %1998 = vmatprep.subr.bf16.mxu1 %v3171_v15 }
 0x138   :  { %1956 = vmatpush2.bf16.msra.mxu0 %v3166_v16 }
 0x139   :  { %1999 = vmatpush2.bf16.msra.mxu1 %v3169_v17  ;;  %1957 = vmatprep.subr.bf16.mxu0 %v3174_v18  ;;  %v3207_v17 = vld [vmem:[#allocation7 + $0x40] sm:$0xff]  }
 0x13a   :  { %2000 = vmatprep.subr.bf16.mxu1 %v3177_v19  ;;  %v3208_v18 = vld [vmem:[#allocation7] sm:$0xff]   ;;  %v3209_v19 = vld [vmem:[#allocation9 + $0x38] sm:$0xff]  }
 0x13c   :  { %1958 = vmatpush2.bf16.msra.mxu0 %v3172_v20  ;;  %v3364_v20 = vmov 0.0  }
 0x13d   :  { %2001 = vmatpush2.bf16.msra.mxu1 %v3175_v21  ;;  %1959 = vmatprep.subr.bf16.mxu0 %v3180_v22  ;;  %v3210_v21 = vld [vmem:[#allocation9 + $0x30] sm:$0xff]   ;;  %v3211_v22 = vld [vmem:[#allocation9 + $0x28] sm:$0xff]  }
 0x13e   :  { %2002 = vmatprep.subr.bf16.mxu1 %v3183_v23  ;;  %v3212_v23 = vld [vmem:[#allocation9 + $0x20] sm:$0xff]  }
 0x140   :  { %1960 = vmatpush2.bf16.msra.mxu0 %v3178_v24  ;;  %v3213_v24 = vld [vmem:[#allocation9 + $0x18] sm:$0xff]  }
 0x141   :  { %2003 = vmatpush2.bf16.msra.mxu1 %v3181_v25  ;;  %1961 = vmatprep.subr.bf16.mxu0 %v3186_v27 }
 0x142   :  { %2004 = vmatprep.subr.bf16.mxu1 %v3189_v28 }
 0x144   :  { %1962 = vmatpush2.bf16.msra.mxu0 %v3184_v29 }
 0x145   :  { %2005 = vmatpush2.bf16.msra.mxu1 %v3187_v30  ;;  %1963 = vmatprep.subr.bf16.mxu0 %v3192_v33 }
 0x146   :  { %2720 = vmatprep.subr.bf16.mxu1 %v3193_v55  ;;  %v3216_v55 = vld [vmem:[#allocation9] sm:$0xff]  }
 0x148   :  { %2007 = vmatmul.mubr.bf16.vlgmr.msra.gmra.mxu1 %v141_v34  ;;  %1964 = vmatpush2.bf16.msra.mxu0 %v3190_v35 }
 0x149   :  { %2721 = vmatpush3.bf16.msra.mxu1 %v3194_v56  ;;  %2760 = vmatprep.subr.bf16.mxu0 %v3364_v20  ;;  %v3217_v56 = vld [vmem:[#allocation10 + $0x38] sm:$0xff]  }
 0x14a   :  { %2722 = vmatprep.subr.bf16.mxu1 %v3195_v57  ;;  %v3218_v57 = vld [vmem:[#allocation10 + $0x30] sm:$0xff]  }
 0x14b   :  { %v1721_v43 = vpop.f32.mrf.mxu0  ;;  %1966 = vmatmul.mubr.bf16.vlgmr.msra.gmra.mxu0 %v139_v40 }
 0x14c   :  { %v1762_v44 = vpop.f32.mrf.mxu1  ;;  %v1722_v45 = vadd.f32 %v1721_v43, %v401_v41  ;;  %2761 = vmatpush3.bf16.msra.mxu0 %v3209_v19  ;;  %2776 = vmatprep.mubr.msk.bf16.mxu0 %vm3365_vm3, %v3364_v20 }
 0x14d   :  { %v1723_v46 = vpop.f32.mrf.mxu0  ;;  %2723 = vmatpush3.bf16.msra.mxu1 %v3196_v58  ;;  %2762 = vmatprep.subr.bf16.mxu0 %v3364_v20  ;;  %v3219_v58 = vld [vmem:[#allocation10 + $0x28] sm:$0xff]  }
 0x14e   :  { %v1764_v47 = vpop.f32.mrf.mxu1  ;;  %v1763_v48 = vadd.f32 %v1762_v44, %v1722_v45  ;;  %v1724_v49 = vadd.f32 %v1723_v46, %v405_v42  ;;  %2724 = vmatprep.subr.bf16.mxu1 %v3197_v59  ;;  %v3220_v59 = vld [vmem:[#allocation10 + $0x20] sm:$0xff]  }
 0x14f   :  { %v1725_v50 = vpop.f32.mrf.mxu0 }
 0x150   :  { %v1766_v51 = vpop.f32.mrf.mxu1  ;;  %v1765_v52 = vadd.f32 %v1764_v47, %v1724_v49  ;;  %2763 = vmatpush3.bf16.msra.mxu0 %v3210_v21 }
 0x151   :  { %v1726_v53 = vpop.f32.mrf.mxu0  ;;  %2725 = vmatpush3.bf16.msra.mxu1 %v3198_v60  ;;  %2764 = vmatprep.subr.bf16.mxu0 %v3364_v20  ;;  %v3221_v60 = vld [vmem:[#allocation10 + $0x18] sm:$0xff]  }
 0x152   :  { %v1767_v54 = vpop.f32.mrf.mxu1  ;;  %2726 = vmatprep.subr.bf16.mxu1 %v3199_v61  ;;  %v3214_v53 = vld [vmem:[#allocation9 + $0x10] sm:$0xff]  }
 0x153   :  { %v3215_v54 = vld [vmem:[#allocation9 + $0x8] sm:$0xff]   ;;  %v3222_v61 = vld [vmem:[#allocation10 + $0x10] sm:$0xff]  }
 0x154   :  { %2765 = vmatpush3.bf16.msra.mxu0 %v3211_v22 }
 0x155   :  { %2727 = vmatpush3.bf16.msra.mxu1 %v3200_v62  ;;  %2766 = vmatprep.subr.bf16.mxu0 %v3364_v20 }
 0x156   :  { %2728 = vmatprep.subr.bf16.mxu1 %v3201_v63  ;;  %v2685_v63 = vld [vmem:[%s3477_s4] ss:$0 sm:$0xff] }
 0x158   :  { %2767 = vmatpush3.bf16.msra.mxu0 %v3212_v23 }
 0x159   :  { %2729 = vmatpush3.bf16.msra.mxu1 %v3202_v0  ;;  %2768 = vmatprep.subr.bf16.mxu0 %v3364_v20 }
 0x15a   :  { %2730 = vmatprep.subr.bf16.mxu1 %v3203_v1 }
 0x15c   :  { %2769 = vmatpush3.bf16.msra.mxu0 %v3213_v24 }
 0x15d   :  { %2731 = vmatpush3.bf16.msra.mxu1 %v3204_v2  ;;  %2770 = vmatprep.subr.bf16.mxu0 %v3364_v20 }
 0x15e   :  { %2732 = vmatprep.subr.bf16.mxu1 %v3205_v8  ;;  %v3224_v8 = vld [vmem:[#allocation10] sm:$0xff]  }
 0x160   :  { %2771 = vmatpush3.bf16.msra.mxu0 %v3214_v53 }
 0x161   :  { %2733 = vmatpush3.bf16.msra.mxu1 %v3206_v11  ;;  %2772 = vmatprep.subr.bf16.mxu0 %v3364_v20 }
 0x162   :  { %2734 = vmatprep.subr.bf16.mxu1 %v3207_v17  ;;  %v2711_v17 = vld [vmem:[%s3481_s8] ss:$0 sm:$0xff] }
 0x164   :  { %2773 = vmatpush3.bf16.msra.mxu0 %v3215_v54 }
 0x165   :  { %2735 = vmatpush3.bf16.msra.mxu1 %v3208_v18  ;;  %2774 = vmatprep.subr.bf16.mxu0 %v3364_v20 }
 0x166   :  { %2780 = vmatprep.subr.bf16.mxu1 %v3364_v20 }
 0x168   :  { %2775 = vmatpush3.bf16.msra.mxu0 %v3216_v55 }
 0x18b   :  { %v1803_v3 = vpop.f32.mrf.mxu0 }
 0x18c   :  { %v1844_v4 = vpop.f32.mrf.mxu1  ;;  %v1804_v5 = vadd.f32 %v1803_v3, %v1763_v48 }
 0x18d   :  { %v1805_v6 = vpop.f32.mrf.mxu0 }
 0x18e   :  { %v1846_v7 = vpop.f32.mrf.mxu1  ;;  %v1845_v9 = vadd.f32 %v1844_v4, %v1804_v5  ;;  %v1806_v10 = vadd.f32 %v1805_v6, %v1765_v52 }
 0x18f   :  { %v1807_v12 = vpop.f32.mrf.mxu0 }
 0x190   :  { %v1848_v13 = vpop.f32.mrf.mxu1  ;;  %v1847_v14 = vadd.f32 %v1846_v7, %v1806_v10  ;;  %v3223_v7 = vld [vmem:[#allocation10 + $0x8] sm:$0xff]  }
 0x191   :  { %v1808_v15 = vpop.f32.mrf.mxu0 }
 0x192   :  { %v1849_v16 = vpop.f32.mrf.mxu1 }
 0x1cb   :  { %v1885_v25 = vpop.f32.mrf.mxu0 }
 0x1cc   :  { %v1926_v26 = vpop.f32.mrf.mxu1  ;;  %v1886_v27 = vadd.f32 %v1885_v25, %v1845_v9  ;;  %v2702_v9 = vld [vmem:[%s3479_s6] ss:$0 sm:$0xff] }
 0x1cd   :  { %v1887_v28 = vpop.f32.mrf.mxu0 }
 0x1ce   :  { %v1928_v29 = vpop.f32.mrf.mxu1  ;;  %v1927_v30 = vadd.f32 %v1926_v26, %v1886_v27  ;;  %v1888_v36 = vadd.f32 %v1887_v28, %v1847_v14 }
 0x1cf   :  { %v1889_v31 = vpop.f32.mrf.mxu0 }
 0x1d0   :  { %v1930_v32 = vpop.f32.mrf.mxu1  ;;  %v1929_v40 = vadd.f32 %v1928_v29, %v1888_v36 }
 0x1d1   :  { %v1890_v33 = vpop.f32.mrf.mxu0 }
 0x1d2   :  { %v1931_v34 = vpop.f32.mrf.mxu1 }
 0x208   :  { %v2008_v35 = vpop.f32.mrf.mxu1 }
 0x20a   :  { %v2010_v37 = vpop.f32.mrf.mxu1 }
 0x20b   :  { %v1967_v38 = vpop.f32.mrf.mxu0 }
 0x20c   :  { %v2012_v39 = vpop.f32.mrf.mxu1  ;;  %v1968_v41 = vadd.f32 %v1967_v38, %v1927_v30 }
 0x20d   :  { %v1969_v42 = vpop.f32.mrf.mxu0 }
 0x20e   :  { %v2013_v43 = vpop.f32.mrf.mxu1  ;;  %v2009_v44 = vadd.f32 %v2008_v35, %v1968_v41  ;;  %v1970_v45 = vadd.f32 %v1969_v42, %v1929_v40 }
 0x20f   :  { %v1971_v46 = vpop.f32.mrf.mxu0 }
 0x210   :  { %v2011_v47 = vadd.f32 %v2010_v37, %v1970_v45  ;;  %v2015_v48 = vmax.f32 %v2009_v44, 0.0 }
 0x211   :  { %v1972_v49 = vpop.f32.mrf.mxu0 }
 0x212   :  { %v2016_v50 = vmax.f32 %v2011_v47, 0.0  ;;  %v2017_v52 = vpack.c.bf16 %v2015_v48, %v2015_v48 }
 0x214   :  { %v2018_v51 = vpack.c.bf16 %v2016_v50, %v2016_v50 }
 0x216   :  { %2186 = vmatprep.mubr.bf16.mxu1 %v2018_v51 }
 0x217   :  { %2187 = vmatmul.mubr.bf16.vlgmr.msra.gmra.mxu1 %v2017_v52 }
 0x218   :  { %2796 = vmatprep.mubr.msk.bf16.mxu1 %vm3365_vm3, %v3364_v20  ;;  %2781 = vmatpush3.bf16.msra.mxu1 %v3217_v56 }
 0x219   :  { %2782 = vmatprep.subr.bf16.mxu1 %v3364_v20 }
 0x21c   :  { %2783 = vmatpush3.bf16.msra.mxu1 %v3218_v57 }
 0x21d   :  { %2784 = vmatprep.subr.bf16.mxu1 %v3364_v20 }
 0x220   :  { %2785 = vmatpush3.bf16.msra.mxu1 %v3219_v58 }
 0x221   :  { %2786 = vmatprep.subr.bf16.mxu1 %v3364_v20 }
 0x224   :  { %2787 = vmatpush3.bf16.msra.mxu1 %v3220_v59 }
 0x225   :  { %2788 = vmatprep.subr.bf16.mxu1 %v3364_v20 }
 0x228   :  { %2789 = vmatpush3.bf16.msra.mxu1 %v3221_v60 }
 0x229   :  { %2790 = vmatprep.subr.bf16.mxu1 %v3364_v20 }
 0x22c   :  { %2791 = vmatpush3.bf16.msra.mxu1 %v3222_v61 }
 0x22d   :  { %2792 = vmatprep.subr.bf16.mxu1 %v3364_v20 }
 0x230   :  { %2793 = vmatpush3.bf16.msra.mxu1 %v3223_v7 }
 0x231   :  { %2794 = vmatprep.subr.bf16.mxu1 %v3364_v20 }
 0x234   :  { %2795 = vmatpush3.bf16.msra.mxu1 %v3224_v8 }
 0x2d7   :  { %v2736_v62 = vpop.f32.mrf.mxu1 }
 0x2d9   :  { %v2737_v0 = vpop.f32.mrf.mxu1 }
 0x2da   :  { %v2738_v1 = vadd.f32 %v2737_v0, %v2736_v62 }
 0x2db   :  { %v2739_v2 = vpop.f32.mrf.mxu1 }
 0x2dc   :  { %v2189_v3 = vadd.f32 %v2738_v1, %v2685_v63 }
 0x2dd   :  { %v2740_v4 = vpop.f32.mrf.mxu1 }
 0x2de   :  { %v2194_v5 = vmax.f32 %v2189_v3, 0.0 }
 0x2e0   :  { %v2195_v6 = vpack.c.bf16 %v2194_v5, %v2194_v5 }
 0x2e2   :  { %2777 = vmatmul.mubr.bf16.vlgmr.msra.gmra.mxu0 %v2195_v6 }
 0x3a2   :  { %v2301_v10 = vpop.f32.mrf.mxu0 }
 0x3a3   :  { %v2302_v11 = vadd.f32 %v2702_v9, %v2301_v10 }
 0x3a4   :  { %v2778_v12 = vpop.f32.mrf.mxu0 }
 0x3a5   :  { %v2307_v13 = vmax.f32 %v2302_v11, 0.0 }
 0x3a6   :  { %v2304_v14 = vpop.f32.mrf.mxu0 }
 0x3a7   :  { %v2308_v15 = vpack.c.bf16 %v2307_v13, %v2307_v13 }
 0x3a8   :  { %v2779_v16 = vpop.f32.mrf.mxu0 }
 0x3a9   :  { %2797 = vmatmul.mubr.bf16.vlgmr.msra.gmra.mxu1 %v2308_v15 }
 0x469   :  { %v2414_v18 = vpop.f32.mrf.mxu1 }
 0x46a   :  { %v2415_v19 = vadd.f32 %v2711_v17, %v2414_v18 }
 0x46b   :  { %v2798_v20 = vpop.f32.mrf.mxu1 }
 0x46c   :  { %v2420_v21 = vpack.c.bf16 %v2415_v19, %v2415_v19 }
 0x46d   :  { %v2417_v22 = vpop.f32.mrf.mxu1 }
 0x46e   :  { %2421 = vst [vmem:[%s3482_s9] sm:$0xf] %v2420_v21 }
 0x46f   :  { %v2799_v23 = vpop.f32.mrf.mxu1 }
 0x470   :  { %2426 = vsyncpa [#allocation3], 1 }
 0x471   :  { %2427 = vsyncpa [#allocation5], 1 }
 0x472   :  { %2428 = vsyncpa [#allocation8], 1 }
 0x473   :  { %2429 = vsyncpa [#allocation11], 1 }

</bundles_post_ra>
